<compile_context>
chip_gen: v7x
topology: tpu7x:2x2x1
jax: 0.10.0
libtpu: 0.0.40
codegen_flags: <defaults>
</compile_context>

<pallas_src>
import jax
import jax.numpy as jnp
import numpy as np
from jax.experimental import pallas as pl
from jax.experimental.pallas import tpu as pltpu


# ---------------------------------------------------------------------------
# Fused forward kernel: one image per grid step, everything VMEM-resident.
# Activation layout: rows = H, lanes = channel*W  (e.g. conv1 out [28, 6*28]).
# ---------------------------------------------------------------------------
def _lenet_kernel(x_ref,
                  c1w_ref, c1b_ref, p1s_ref, p1t_ref,
                  c2w_ref, c2b_ref, p2s_ref, p2t_ref,
                  f1w_ref, f1b_ref, f2w_ref, f2b_ref, f3w_ref, f3b_ref,
                  out_ref):
    f32 = jnp.float32
    x = x_ref[0]                                                  # [32, 32]

    # conv1 (1->6, 5x5, valid) + bias + ReLU  ->  [28, 6*28]
    h1 = jnp.zeros((28, 6 * 28), f32)
    for ki in range(5):                                           # 5 row taps
        h1 = h1 + jnp.dot(x[ki:ki + 28, :], c1w_ref[ki],
                          preferred_element_type=f32)
    h1 = jnp.maximum(h1 + c1b_ref[...], 0.0)

    # 2x2 max-pool  ->  [14, 6*14]
    mv = jnp.maximum(h1[0:27, :], h1[1:28, :])                    # row pairs
    pv = jnp.dot(p1s_ref[...], mv, preferred_element_type=f32)    # even rows
    mh = jnp.maximum(pv[:, 0:167], pv[:, 1:168])                  # lane pairs
    p1 = jnp.dot(mh, p1t_ref[...], preferred_element_type=f32)    # even lanes

    # conv2 (6->16, 5x5, valid) + bias + ReLU  ->  [10, 16*10]
    h2 = jnp.zeros((10, 16 * 10), f32)
    for ki in range(5):
        h2 = h2 + jnp.dot(p1[ki:ki + 10, :], c2w_ref[ki],
                          preferred_element_type=f32)
    h2 = jnp.maximum(h2 + c2b_ref[...], 0.0)

    # 2x2 max-pool  ->  [5, 16*5]
    mv2 = jnp.maximum(h2[0:9, :], h2[1:10, :])
    pv2 = jnp.dot(p2s_ref[...], mv2, preferred_element_type=f32)
    mh2 = jnp.maximum(pv2[:, 0:159], pv2[:, 1:160])
    p2 = jnp.dot(mh2, p2t_ref[...], preferred_element_type=f32)   # [5, 80]

    # fc1 (400 -> 120, padded to 128 lanes) + ReLU
    a = jnp.zeros((1, 128), f32)
    for h in range(5):                                            # rows of p2
        a = a + jnp.dot(p2[h:h + 1, :], f1w_ref[h],
                        preferred_element_type=f32)
    a = jnp.maximum(a + f1b_ref[...], 0.0)

    # fc2 (120 -> 84, padded) + ReLU
    a = jnp.maximum(jnp.dot(a, f2w_ref[...], preferred_element_type=f32)
                    + f2b_ref[...], 0.0)

    # fc3 (84 -> 10, padded to 128 so the HBM store is a full 128-lane store)
    out_ref[0] = (jnp.dot(a, f3w_ref[...], preferred_element_type=f32)
                  + f3b_ref[...])


# ---------------------------------------------------------------------------
# One-time weight packing (host side, NOT per forward call).
# ---------------------------------------------------------------------------
def prepare_params(p):
    f32 = jnp.float32
    w1 = p["conv1_w"].astype(f32)            # [6, 1, 5, 5]
    w2 = p["conv2_w"].astype(f32)            # [16, 6, 5, 5]

    # conv1 as 5 row-tap matmuls: c1w[ki, w, co*28+ow] = w1[co,0,ki,w-ow]
    ow1 = np.arange(28); wi1 = np.arange(32)
    d1 = wi1[:, None] - ow1[None, :]                      # [32, 28]
    m1 = (d1 >= 0) & (d1 <= 4)
    g1 = w1[:, 0][:, :, np.clip(d1, 0, 4)]                # [6,5,32,28] (co,ki,w,ow)
    g1 = jnp.where(jnp.asarray(m1)[None, None], g1, 0.0)
    c1w = jnp.transpose(g1, (1, 2, 0, 3)).reshape(5, 32, 6 * 28)

    # conv2 as 5 row-tap matmuls: c2w[ki, ci*14+w, co*10+ow] = w2[co,ci,ki,w-ow]
    ow2 = np.arange(10); wi2 = np.arange(14)
    d2 = wi2[:, None] - ow2[None, :]                      # [14, 10]
    m2 = (d2 >= 0) & (d2 <= 4)
    g2 = w2[:, :, :, np.clip(d2, 0, 4)]                   # [16,6,5,14,10]
    g2 = jnp.where(jnp.asarray(m2)[None, None, None], g2, 0.0)
    c2w = jnp.transpose(g2, (2, 1, 3, 0, 4)).reshape(5, 6 * 14, 16 * 10)

    c1b = jnp.repeat(p["conv1_b"].astype(f32), 28)[None, :]   # [1, 168]
    c2b = jnp.repeat(p["conv2_b"].astype(f32), 10)[None, :]   # [1, 160]

    # Exact 0/1 selection matrices for the stride-2 pooling subsample.
    p1s = np.zeros((14, 27), np.float32)
    p1s[np.arange(14), 2 * np.arange(14)] = 1.0
    p1t = np.zeros((167, 84), np.float32)
    for c in range(6):
        p1t[c * 28 + 2 * np.arange(14), c * 14 + np.arange(14)] = 1.0
    p2s = np.zeros((5, 9), np.float32)
    p2s[np.arange(5), 2 * np.arange(5)] = 1.0
    p2t = np.zeros((159, 80), np.float32)
    for c in range(16):
        p2t[c * 10 + 2 * np.arange(5), c * 5 + np.arange(5)] = 1.0

    # fc weights: [in, out] layout, outputs padded to 128 lanes.
    f1w = jnp.transpose(p["fc1_w"].reshape(120, 16, 5, 5),
                        (2, 1, 3, 0)).reshape(5, 80, 120)     # [h, c*5+w, j]
    f1w = jnp.pad(f1w, ((0, 0), (0, 0), (0, 8)))              # -> [5, 80, 128]
    f2w = jnp.pad(p["fc2_w"].T, ((0, 8), (0, 44)))            # [120,84]->[128,128]
    f3w = jnp.pad(p["fc3_w"].T, ((0, 44), (0, 118)))          # [84,10] ->[128,128]
    f1b = jnp.pad(p["fc1_b"], (0, 8))[None, :]
    f2b = jnp.pad(p["fc2_b"], (0, 44))[None, :]
    f3b = jnp.pad(p["fc3_b"], (0, 118))[None, :]

    return dict(c1w=c1w, c1b=c1b, p1s=jnp.asarray(p1s), p1t=jnp.asarray(p1t),
                c2w=c2w, c2b=c2b, p2s=jnp.asarray(p2s), p2t=jnp.asarray(p2t),
                f1w=f1w, f1b=f1b, f2w=f2w, f2b=f2b, f3w=f3w, f3b=f3b)


# ---------------------------------------------------------------------------
# Forward pass (matches CNN.forward)
# ---------------------------------------------------------------------------
@jax.jit
def cnn_forward(prep, x):
    n = x.shape[0]
    x2 = x.reshape(n, 32, 32).astype(jnp.float32)   # squeeze Cin=1 (metadata only)

    def resident(arr):
        nd = arr.ndim
        return pl.BlockSpec(arr.shape, lambda i, _nd=nd: (0,) * _nd)

    weights = (prep["c1w"], prep["c1b"], prep["p1s"], prep["p1t"],
               prep["c2w"], prep["c2b"], prep["p2s"], prep["p2t"],
               prep["f1w"], prep["f1b"], prep["f2w"], prep["f2b"],
               prep["f3w"], prep["f3b"])

    flops_per_img = 2 * (5 * 28 * 32 * 168 + 14 * 27 * 168 + 14 * 167 * 84
                         + 5 * 10 * 84 * 160 + 5 * 9 * 160 + 5 * 159 * 80
                         + 5 * 80 * 128 + 2 * 128 * 128)
    bytes_w = sum(int(w.size) * 4 for w in weights)
    cost = pl.CostEstimate(flops=n * flops_per_img, transcendentals=0,
                           bytes_accessed=n * (32 * 32 + 128) * 4 + bytes_w)

    out = pl.pallas_call(
        _lenet_kernel,
        out_shape=jax.ShapeDtypeStruct((n, 1, 128), jnp.float32),
        grid=(n,),
        in_specs=[pl.BlockSpec((1, 32, 32), lambda i: (i, 0, 0))]
                 + [resident(w) for w in weights],
        out_specs=pl.BlockSpec((1, 1, 128), lambda i: (i, 0, 0)),
        compiler_params=pltpu.CompilerParams(
            dimension_semantics=("parallel",)),
        cost_estimate=cost,
    )(x2, *weights)
    return out[:, 0, :10]


# ---------------------------------------------------------------------------
# Parameters (deterministic, PyTorch-style uniform fan-in init, torch layout)
# ---------------------------------------------------------------------------
def init_params(key):
    ks = jax.random.split(key, 10)

    def u(k, shape, fan_in):
        bound = 1.0 / jnp.sqrt(jnp.float32(fan_in))
        return jax.random.uniform(k, shape, jnp.float32, -bound, bound)

    return {
        "conv1_w": u(ks[0], (6, 1, 5, 5), 1 * 5 * 5),
        "conv1_b": u(ks[1], (6,), 1 * 5 * 5),
        "conv2_w": u(ks[2], (16, 6, 5, 5), 6 * 5 * 5),
        "conv2_b": u(ks[3], (16,), 6 * 5 * 5),
        "fc1_w": u(ks[4], (120, 400), 400),
        "fc1_b": u(ks[5], (120,), 400),
        "fc2_w": u(ks[6], (84, 120), 120),
        "fc2_b": u(ks[7], (84,), 120),
        "fc3_w": u(ks[8], (10, 84), 84),
        "fc3_b": u(ks[9], (10,), 84),
    }


if __name__ == "__main__":
    key = jax.random.PRNGKey(0)
    pkey, xkey = jax.random.split(key)
    params = init_params(pkey)
    prep = prepare_params(params)            # one-time weight packing
    # 32x32 single-channel input is implied by fc1 = Linear(5*5*16, 120)
    x = jax.random.normal(xkey, (2, 1, 32, 32), jnp.float32)
    out = cnn_forward(prep, x)
    jax.block_until_ready(out)
    assert out.shape == (2, 10) and out.dtype == jnp.float32
    print("KERNEL_OK")
</pallas_src>

<mosaic_0001>
module attributes {stable_mosaic.version = 11 : i64} {
  func.func @_lenet_kernel(%arg0: i32, %arg1: memref<1x32x32xf32, #tpu.memory_space<vmem>>, %arg2: memref<5x32x168xf32, #tpu.memory_space<vmem>>, %arg3: memref<1x168xf32, #tpu.memory_space<vmem>>, %arg4: memref<14x27xf32, #tpu.memory_space<vmem>>, %arg5: memref<167x84xf32, #tpu.memory_space<vmem>>, %arg6: memref<5x84x160xf32, #tpu.memory_space<vmem>>, %arg7: memref<1x160xf32, #tpu.memory_space<vmem>>, %arg8: memref<5x9xf32, #tpu.memory_space<vmem>>, %arg9: memref<159x80xf32, #tpu.memory_space<vmem>>, %arg10: memref<5x80x128xf32, #tpu.memory_space<vmem>>, %arg11: memref<1x128xf32, #tpu.memory_space<vmem>>, %arg12: memref<128x128xf32, #tpu.memory_space<vmem>>, %arg13: memref<1x128xf32, #tpu.memory_space<vmem>>, %arg14: memref<128x128xf32, #tpu.memory_space<vmem>>, %arg15: memref<1x128xf32, #tpu.memory_space<vmem>>, %arg16: memref<1x1x128xf32, #tpu.memory_space<vmem>>) attributes {dimension_semantics = [#tpu.dimension_semantics<parallel>], iteration_bounds = array<i64: 2>, scalar_prefetch = 0 : i64, scratch_operands = 0 : i64, tpu.core_type = #tpu.core_type<tc>, window_params = [{transform_indices = @transform_0, window_bounds = array<i64: 1, 32, 32>}, {pipeline_mode = #tpu.pipeline_mode<synchronous>, transform_indices = @transform_1, window_bounds = array<i64: 5, 32, 168>}, {pipeline_mode = #tpu.pipeline_mode<synchronous>, transform_indices = @transform_2, window_bounds = array<i64: 1, 168>}, {pipeline_mode = #tpu.pipeline_mode<synchronous>, transform_indices = @transform_3, window_bounds = array<i64: 14, 27>}, {pipeline_mode = #tpu.pipeline_mode<synchronous>, transform_indices = @transform_4, window_bounds = array<i64: 167, 84>}, {pipeline_mode = #tpu.pipeline_mode<synchronous>, transform_indices = @transform_5, window_bounds = array<i64: 5, 84, 160>}, {pipeline_mode = #tpu.pipeline_mode<synchronous>, transform_indices = @transform_6, window_bounds = array<i64: 1, 160>}, {pipeline_mode = #tpu.pipeline_mode<synchronous>, transform_indices = @transform_7, window_bounds = array<i64: 5, 9>}, {pipeline_mode = #tpu.pipeline_mode<synchronous>, transform_indices = @transform_8, window_bounds = array<i64: 159, 80>}, {pipeline_mode = #tpu.pipeline_mode<synchronous>, transform_indices = @transform_9, window_bounds = array<i64: 5, 80, 128>}, {pipeline_mode = #tpu.pipeline_mode<synchronous>, transform_indices = @transform_10, window_bounds = array<i64: 1, 128>}, {pipeline_mode = #tpu.pipeline_mode<synchronous>, transform_indices = @transform_11, window_bounds = array<i64: 128, 128>}, {pipeline_mode = #tpu.pipeline_mode<synchronous>, transform_indices = @transform_12, window_bounds = array<i64: 1, 128>}, {pipeline_mode = #tpu.pipeline_mode<synchronous>, transform_indices = @transform_13, window_bounds = array<i64: 128, 128>}, {pipeline_mode = #tpu.pipeline_mode<synchronous>, transform_indices = @transform_14, window_bounds = array<i64: 1, 128>}, {transform_indices = @transform_15, window_bounds = array<i64: 1, 1, 128>}]} {
    %c0 = arith.constant 0 : index
    %c0_0 = arith.constant 0 : index
    %c0_1 = arith.constant 0 : index
    %0 = vector.load %arg1[%c0, %c0_0, %c0_1] : memref<1x32x32xf32, #tpu.memory_space<vmem>>, vector<1x32x32xf32>
    %1 = vector.shape_cast %0 : vector<1x32x32xf32> to vector<32x32xf32>
    %cst = arith.constant 0.000000e+00 : f32
    %2 = vector.broadcast %cst : f32 to vector<28x168xf32>
    %3 = vector.extract_strided_slice %1 {offsets = [0, 0], sizes = [28, 32], strides = [1, 1]} : vector<32x32xf32> to vector<28x32xf32>
    %c0_2 = arith.constant 0 : index
    %c0_3 = arith.constant 0 : index
    %c0_4 = arith.constant 0 : index
    %4 = vector.load %arg2[%c0_2, %c0_3, %c0_4] : memref<5x32x168xf32, #tpu.memory_space<vmem>>, vector<1x32x168xf32>
    %5 = vector.shape_cast %4 : vector<1x32x168xf32> to vector<32x168xf32>
    %cst_5 = arith.constant dense<0.000000e+00> : vector<28x168xf32>
    %6 = tpu.matmul %3, %5, %cst_5 {dimension_numbers = #tpu.dot_dimension_numbers<[1], [0], [0], [1], [0, 0, 1, 1], [], []>} : vector<28x32xf32>, vector<32x168xf32>, vector<28x168xf32> -> vector<28x168xf32>
    %7 = arith.addf %2, %6 : vector<28x168xf32>
    %8 = vector.extract_strided_slice %1 {offsets = [1, 0], sizes = [28, 32], strides = [1, 1]} : vector<32x32xf32> to vector<28x32xf32>
    %c1 = arith.constant 1 : index
    %c0_6 = arith.constant 0 : index
    %c0_7 = arith.constant 0 : index
    %9 = vector.load %arg2[%c1, %c0_6, %c0_7] : memref<5x32x168xf32, #tpu.memory_space<vmem>>, vector<1x32x168xf32>
    %10 = vector.shape_cast %9 : vector<1x32x168xf32> to vector<32x168xf32>
    %cst_8 = arith.constant dense<0.000000e+00> : vector<28x168xf32>
    %11 = tpu.matmul %8, %10, %cst_8 {dimension_numbers = #tpu.dot_dimension_numbers<[1], [0], [0], [1], [0, 0, 1, 1], [], []>} : vector<28x32xf32>, vector<32x168xf32>, vector<28x168xf32> -> vector<28x168xf32>
    %12 = arith.addf %7, %11 : vector<28x168xf32>
    %13 = vector.extract_strided_slice %1 {offsets = [2, 0], sizes = [28, 32], strides = [1, 1]} : vector<32x32xf32> to vector<28x32xf32>
    %c2 = arith.constant 2 : index
    %c0_9 = arith.constant 0 : index
    %c0_10 = arith.constant 0 : index
    %14 = vector.load %arg2[%c2, %c0_9, %c0_10] : memref<5x32x168xf32, #tpu.memory_space<vmem>>, vector<1x32x168xf32>
    %15 = vector.shape_cast %14 : vector<1x32x168xf32> to vector<32x168xf32>
    %cst_11 = arith.constant dense<0.000000e+00> : vector<28x168xf32>
    %16 = tpu.matmul %13, %15, %cst_11 {dimension_numbers = #tpu.dot_dimension_numbers<[1], [0], [0], [1], [0, 0, 1, 1], [], []>} : vector<28x32xf32>, vector<32x168xf32>, vector<28x168xf32> -> vector<28x168xf32>
    %17 = arith.addf %12, %16 : vector<28x168xf32>
    %18 = vector.extract_strided_slice %1 {offsets = [3, 0], sizes = [28, 32], strides = [1, 1]} : vector<32x32xf32> to vector<28x32xf32>
    %c3 = arith.constant 3 : index
    %c0_12 = arith.constant 0 : index
    %c0_13 = arith.constant 0 : index
    %19 = vector.load %arg2[%c3, %c0_12, %c0_13] : memref<5x32x168xf32, #tpu.memory_space<vmem>>, vector<1x32x168xf32>
    %20 = vector.shape_cast %19 : vector<1x32x168xf32> to vector<32x168xf32>
    %cst_14 = arith.constant dense<0.000000e+00> : vector<28x168xf32>
    %21 = tpu.matmul %18, %20, %cst_14 {dimension_numbers = #tpu.dot_dimension_numbers<[1], [0], [0], [1], [0, 0, 1, 1], [], []>} : vector<28x32xf32>, vector<32x168xf32>, vector<28x168xf32> -> vector<28x168xf32>
    %22 = arith.addf %17, %21 : vector<28x168xf32>
    %23 = vector.extract_strided_slice %1 {offsets = [4, 0], sizes = [28, 32], strides = [1, 1]} : vector<32x32xf32> to vector<28x32xf32>
    %c4 = arith.constant 4 : index
    %c0_15 = arith.constant 0 : index
    %c0_16 = arith.constant 0 : index
    %24 = vector.load %arg2[%c4, %c0_15, %c0_16] : memref<5x32x168xf32, #tpu.memory_space<vmem>>, vector<1x32x168xf32>
    %25 = vector.shape_cast %24 : vector<1x32x168xf32> to vector<32x168xf32>
    %cst_17 = arith.constant dense<0.000000e+00> : vector<28x168xf32>
    %26 = tpu.matmul %23, %25, %cst_17 {dimension_numbers = #tpu.dot_dimension_numbers<[1], [0], [0], [1], [0, 0, 1, 1], [], []>} : vector<28x32xf32>, vector<32x168xf32>, vector<28x168xf32> -> vector<28x168xf32>
    %27 = arith.addf %22, %26 : vector<28x168xf32>
    %c0_18 = arith.constant 0 : index
    %c0_19 = arith.constant 0 : index
    %28 = vector.load %arg3[%c0_18, %c0_19] : memref<1x168xf32, #tpu.memory_space<vmem>>, vector<1x168xf32>
    %29 = vector.broadcast %28 : vector<1x168xf32> to vector<28x168xf32>
    %30 = arith.addf %27, %29 : vector<28x168xf32>
    %cst_20 = arith.constant 0.000000e+00 : f32
    %31 = vector.broadcast %cst_20 : f32 to vector<28x168xf32>
    %32 = arith.maximumf %30, %31 : vector<28x168xf32>
    %33 = vector.extract_strided_slice %32 {offsets = [0, 0], sizes = [27, 168], strides = [1, 1]} : vector<28x168xf32> to vector<27x168xf32>
    %34 = vector.extract_strided_slice %32 {offsets = [1, 0], sizes = [27, 168], strides = [1, 1]} : vector<28x168xf32> to vector<27x168xf32>
    %35 = arith.maximumf %33, %34 : vector<27x168xf32>
    %c0_21 = arith.constant 0 : index
    %c0_22 = arith.constant 0 : index
    %36 = vector.load %arg4[%c0_21, %c0_22] : memref<14x27xf32, #tpu.memory_space<vmem>>, vector<14x27xf32>
    %cst_23 = arith.constant dense<0.000000e+00> : vector<14x168xf32>
    %37 = tpu.matmul %36, %35, %cst_23 {dimension_numbers = #tpu.dot_dimension_numbers<[1], [0], [0], [1], [0, 0, 1, 1], [], []>} : vector<14x27xf32>, vector<27x168xf32>, vector<14x168xf32> -> vector<14x168xf32>
    %38 = vector.extract_strided_slice %37 {offsets = [0, 0], sizes = [14, 167], strides = [1, 1]} : vector<14x168xf32> to vector<14x167xf32>
    %39 = vector.extract_strided_slice %37 {offsets = [0, 1], sizes = [14, 167], strides = [1, 1]} : vector<14x168xf32> to vector<14x167xf32>
    %40 = arith.maximumf %38, %39 : vector<14x167xf32>
    %c0_24 = arith.constant 0 : index
    %c0_25 = arith.constant 0 : index
    %41 = vector.load %arg5[%c0_24, %c0_25] : memref<167x84xf32, #tpu.memory_space<vmem>>, vector<167x84xf32>
    %cst_26 = arith.constant dense<0.000000e+00> : vector<14x84xf32>
    %42 = tpu.matmul %40, %41, %cst_26 {dimension_numbers = #tpu.dot_dimension_numbers<[1], [0], [0], [1], [0, 0, 1, 1], [], []>} : vector<14x167xf32>, vector<167x84xf32>, vector<14x84xf32> -> vector<14x84xf32>
    %cst_27 = arith.constant 0.000000e+00 : f32
    %43 = vector.broadcast %cst_27 : f32 to vector<10x160xf32>
    %44 = vector.extract_strided_slice %42 {offsets = [0, 0], sizes = [10, 84], strides = [1, 1]} : vector<14x84xf32> to vector<10x84xf32>
    %c0_28 = arith.constant 0 : index
    %c0_29 = arith.constant 0 : index
    %c0_30 = arith.constant 0 : index
    %45 = vector.load %arg6[%c0_28, %c0_29, %c0_30] : memref<5x84x160xf32, #tpu.memory_space<vmem>>, vector<1x84x160xf32>
    %46 = vector.shape_cast %45 : vector<1x84x160xf32> to vector<84x160xf32>
    %cst_31 = arith.constant dense<0.000000e+00> : vector<10x160xf32>
    %47 = tpu.matmul %44, %46, %cst_31 {dimension_numbers = #tpu.dot_dimension_numbers<[1], [0], [0], [1], [0, 0, 1, 1], [], []>} : vector<10x84xf32>, vector<84x160xf32>, vector<10x160xf32> -> vector<10x160xf32>
    %48 = arith.addf %43, %47 : vector<10x160xf32>
    %49 = vector.extract_strided_slice %42 {offsets = [1, 0], sizes = [10, 84], strides = [1, 1]} : vector<14x84xf32> to vector<10x84xf32>
    %c1_32 = arith.constant 1 : index
    %c0_33 = arith.constant 0 : index
    %c0_34 = arith.constant 0 : index
    %50 = vector.load %arg6[%c1_32, %c0_33, %c0_34] : memref<5x84x160xf32, #tpu.memory_space<vmem>>, vector<1x84x160xf32>
    %51 = vector.shape_cast %50 : vector<1x84x160xf32> to vector<84x160xf32>
    %cst_35 = arith.constant dense<0.000000e+00> : vector<10x160xf32>
    %52 = tpu.matmul %49, %51, %cst_35 {dimension_numbers = #tpu.dot_dimension_numbers<[1], [0], [0], [1], [0, 0, 1, 1], [], []>} : vector<10x84xf32>, vector<84x160xf32>, vector<10x160xf32> -> vector<10x160xf32>
    %53 = arith.addf %48, %52 : vector<10x160xf32>
    %54 = vector.extract_strided_slice %42 {offsets = [2, 0], sizes = [10, 84], strides = [1, 1]} : vector<14x84xf32> to vector<10x84xf32>
    %c2_36 = arith.constant 2 : index
    %c0_37 = arith.constant 0 : index
    %c0_38 = arith.constant 0 : index
    %55 = vector.load %arg6[%c2_36, %c0_37, %c0_38] : memref<5x84x160xf32, #tpu.memory_space<vmem>>, vector<1x84x160xf32>
    %56 = vector.shape_cast %55 : vector<1x84x160xf32> to vector<84x160xf32>
    %cst_39 = arith.constant dense<0.000000e+00> : vector<10x160xf32>
    %57 = tpu.matmul %54, %56, %cst_39 {dimension_numbers = #tpu.dot_dimension_numbers<[1], [0], [0], [1], [0, 0, 1, 1], [], []>} : vector<10x84xf32>, vector<84x160xf32>, vector<10x160xf32> -> vector<10x160xf32>
    %58 = arith.addf %53, %57 : vector<10x160xf32>
    %59 = vector.extract_strided_slice %42 {offsets = [3, 0], sizes = [10, 84], strides = [1, 1]} : vector<14x84xf32> to vector<10x84xf32>
    %c3_40 = arith.constant 3 : index
    %c0_41 = arith.constant 0 : index
    %c0_42 = arith.constant 0 : index
    %60 = vector.load %arg6[%c3_40, %c0_41, %c0_42] : memref<5x84x160xf32, #tpu.memory_space<vmem>>, vector<1x84x160xf32>
    %61 = vector.shape_cast %60 : vector<1x84x160xf32> to vector<84x160xf32>
    %cst_43 = arith.constant dense<0.000000e+00> : vector<10x160xf32>
    %62 = tpu.matmul %59, %61, %cst_43 {dimension_numbers = #tpu.dot_dimension_numbers<[1], [0], [0], [1], [0, 0, 1, 1], [], []>} : vector<10x84xf32>, vector<84x160xf32>, vector<10x160xf32> -> vector<10x160xf32>
    %63 = arith.addf %58, %62 : vector<10x160xf32>
    %64 = vector.extract_strided_slice %42 {offsets = [4, 0], sizes = [10, 84], strides = [1, 1]} : vector<14x84xf32> to vector<10x84xf32>
    %c4_44 = arith.constant 4 : index
    %c0_45 = arith.constant 0 : index
    %c0_46 = arith.constant 0 : index
    %65 = vector.load %arg6[%c4_44, %c0_45, %c0_46] : memref<5x84x160xf32, #tpu.memory_space<vmem>>, vector<1x84x160xf32>
    %66 = vector.shape_cast %65 : vector<1x84x160xf32> to vector<84x160xf32>
    %cst_47 = arith.constant dense<0.000000e+00> : vector<10x160xf32>
    %67 = tpu.matmul %64, %66, %cst_47 {dimension_numbers = #tpu.dot_dimension_numbers<[1], [0], [0], [1], [0, 0, 1, 1], [], []>} : vector<10x84xf32>, vector<84x160xf32>, vector<10x160xf32> -> vector<10x160xf32>
    %68 = arith.addf %63, %67 : vector<10x160xf32>
    %c0_48 = arith.constant 0 : index
    %c0_49 = arith.constant 0 : index
    %69 = vector.load %arg7[%c0_48, %c0_49] : memref<1x160xf32, #tpu.memory_space<vmem>>, vector<1x160xf32>
    %70 = vector.broadcast %69 : vector<1x160xf32> to vector<10x160xf32>
    %71 = arith.addf %68, %70 : vector<10x160xf32>
    %cst_50 = arith.constant 0.000000e+00 : f32
    %72 = vector.broadcast %cst_50 : f32 to vector<10x160xf32>
    %73 = arith.maximumf %71, %72 : vector<10x160xf32>
    %74 = vector.extract_strided_slice %73 {offsets = [0, 0], sizes = [9, 160], strides = [1, 1]} : vector<10x160xf32> to vector<9x160xf32>
    %75 = vector.extract_strided_slice %73 {offsets = [1, 0], sizes = [9, 160], strides = [1, 1]} : vector<10x160xf32> to vector<9x160xf32>
    %76 = arith.maximumf %74, %75 : vector<9x160xf32>
    %c0_51 = arith.constant 0 : index
    %c0_52 = arith.constant 0 : index
    %77 = vector.load %arg8[%c0_51, %c0_52] : memref<5x9xf32, #tpu.memory_space<vmem>>, vector<5x9xf32>
    %cst_53 = arith.constant dense<0.000000e+00> : vector<5x160xf32>
    %78 = tpu.matmul %77, %76, %cst_53 {dimension_numbers = #tpu.dot_dimension_numbers<[1], [0], [0], [1], [0, 0, 1, 1], [], []>} : vector<5x9xf32>, vector<9x160xf32>, vector<5x160xf32> -> vector<5x160xf32>
    %79 = vector.extract_strided_slice %78 {offsets = [0, 0], sizes = [5, 159], strides = [1, 1]} : vector<5x160xf32> to vector<5x159xf32>
    %80 = vector.extract_strided_slice %78 {offsets = [0, 1], sizes = [5, 159], strides = [1, 1]} : vector<5x160xf32> to vector<5x159xf32>
    %81 = arith.maximumf %79, %80 : vector<5x159xf32>
    %c0_54 = arith.constant 0 : index
    %c0_55 = arith.constant 0 : index
    %82 = vector.load %arg9[%c0_54, %c0_55] : memref<159x80xf32, #tpu.memory_space<vmem>>, vector<159x80xf32>
    %cst_56 = arith.constant dense<0.000000e+00> : vector<5x80xf32>
    %83 = tpu.matmul %81, %82, %cst_56 {dimension_numbers = #tpu.dot_dimension_numbers<[1], [0], [0], [1], [0, 0, 1, 1], [], []>} : vector<5x159xf32>, vector<159x80xf32>, vector<5x80xf32> -> vector<5x80xf32>
    %cst_57 = arith.constant 0.000000e+00 : f32
    %84 = vector.broadcast %cst_57 : f32 to vector<1x128xf32>
    %85 = vector.extract_strided_slice %83 {offsets = [0, 0], sizes = [1, 80], strides = [1, 1]} : vector<5x80xf32> to vector<1x80xf32>
    %c0_58 = arith.constant 0 : index
    %c0_59 = arith.constant 0 : index
    %c0_60 = arith.constant 0 : index
    %86 = vector.load %arg10[%c0_58, %c0_59, %c0_60] : memref<5x80x128xf32, #tpu.memory_space<vmem>>, vector<1x80x128xf32>
    %87 = vector.shape_cast %86 : vector<1x80x128xf32> to vector<80x128xf32>
    %cst_61 = arith.constant dense<0.000000e+00> : vector<1x128xf32>
    %88 = tpu.matmul %85, %87, %cst_61 {dimension_numbers = #tpu.dot_dimension_numbers<[1], [0], [0], [1], [0, 0, 1, 1], [], []>} : vector<1x80xf32>, vector<80x128xf32>, vector<1x128xf32> -> vector<1x128xf32>
    %89 = arith.addf %84, %88 : vector<1x128xf32>
    %90 = vector.extract_strided_slice %83 {offsets = [1, 0], sizes = [1, 80], strides = [1, 1]} : vector<5x80xf32> to vector<1x80xf32>
    %c1_62 = arith.constant 1 : index
    %c0_63 = arith.constant 0 : index
    %c0_64 = arith.constant 0 : index
    %91 = vector.load %arg10[%c1_62, %c0_63, %c0_64] : memref<5x80x128xf32, #tpu.memory_space<vmem>>, vector<1x80x128xf32>
    %92 = vector.shape_cast %91 : vector<1x80x128xf32> to vector<80x128xf32>
    %cst_65 = arith.constant dense<0.000000e+00> : vector<1x128xf32>
    %93 = tpu.matmul %90, %92, %cst_65 {dimension_numbers = #tpu.dot_dimension_numbers<[1], [0], [0], [1], [0, 0, 1, 1], [], []>} : vector<1x80xf32>, vector<80x128xf32>, vector<1x128xf32> -> vector<1x128xf32>
    %94 = arith.addf %89, %93 : vector<1x128xf32>
    %95 = vector.extract_strided_slice %83 {offsets = [2, 0], sizes = [1, 80], strides = [1, 1]} : vector<5x80xf32> to vector<1x80xf32>
    %c2_66 = arith.constant 2 : index
    %c0_67 = arith.constant 0 : index
    %c0_68 = arith.constant 0 : index
    %96 = vector.load %arg10[%c2_66, %c0_67, %c0_68] : memref<5x80x128xf32, #tpu.memory_space<vmem>>, vector<1x80x128xf32>
    %97 = vector.shape_cast %96 : vector<1x80x128xf32> to vector<80x128xf32>
    %cst_69 = arith.constant dense<0.000000e+00> : vector<1x128xf32>
    %98 = tpu.matmul %95, %97, %cst_69 {dimension_numbers = #tpu.dot_dimension_numbers<[1], [0], [0], [1], [0, 0, 1, 1], [], []>} : vector<1x80xf32>, vector<80x128xf32>, vector<1x128xf32> -> vector<1x128xf32>
    %99 = arith.addf %94, %98 : vector<1x128xf32>
    %100 = vector.extract_strided_slice %83 {offsets = [3, 0], sizes = [1, 80], strides = [1, 1]} : vector<5x80xf32> to vector<1x80xf32>
    %c3_70 = arith.constant 3 : index
    %c0_71 = arith.constant 0 : index
    %c0_72 = arith.constant 0 : index
    %101 = vector.load %arg10[%c3_70, %c0_71, %c0_72] : memref<5x80x128xf32, #tpu.memory_space<vmem>>, vector<1x80x128xf32>
    %102 = vector.shape_cast %101 : vector<1x80x128xf32> to vector<80x128xf32>
    %cst_73 = arith.constant dense<0.000000e+00> : vector<1x128xf32>
    %103 = tpu.matmul %100, %102, %cst_73 {dimension_numbers = #tpu.dot_dimension_numbers<[1], [0], [0], [1], [0, 0, 1, 1], [], []>} : vector<1x80xf32>, vector<80x128xf32>, vector<1x128xf32> -> vector<1x128xf32>
    %104 = arith.addf %99, %103 : vector<1x128xf32>
    %105 = vector.extract_strided_slice %83 {offsets = [4, 0], sizes = [1, 80], strides = [1, 1]} : vector<5x80xf32> to vector<1x80xf32>
    %c4_74 = arith.constant 4 : index
    %c0_75 = arith.constant 0 : index
    %c0_76 = arith.constant 0 : index
    %106 = vector.load %arg10[%c4_74, %c0_75, %c0_76] : memref<5x80x128xf32, #tpu.memory_space<vmem>>, vector<1x80x128xf32>
    %107 = vector.shape_cast %106 : vector<1x80x128xf32> to vector<80x128xf32>
    %cst_77 = arith.constant dense<0.000000e+00> : vector<1x128xf32>
    %108 = tpu.matmul %105, %107, %cst_77 {dimension_numbers = #tpu.dot_dimension_numbers<[1], [0], [0], [1], [0, 0, 1, 1], [], []>} : vector<1x80xf32>, vector<80x128xf32>, vector<1x128xf32> -> vector<1x128xf32>
    %109 = arith.addf %104, %108 : vector<1x128xf32>
    %c0_78 = arith.constant 0 : index
    %c0_79 = arith.constant 0 : index
    %110 = vector.load %arg11[%c0_78, %c0_79] : memref<1x128xf32, #tpu.memory_space<vmem>>, vector<1x128xf32>
    %111 = arith.addf %109, %110 : vector<1x128xf32>
    %cst_80 = arith.constant 0.000000e+00 : f32
    %112 = vector.broadcast %cst_80 : f32 to vector<1x128xf32>
    %113 = arith.maximumf %111, %112 : vector<1x128xf32>
    %c0_81 = arith.constant 0 : index
    %c0_82 = arith.constant 0 : index
    %114 = vector.load %arg12[%c0_81, %c0_82] : memref<128x128xf32, #tpu.memory_space<vmem>>, vector<128x128xf32>
    %cst_83 = arith.constant dense<0.000000e+00> : vector<1x128xf32>
    %115 = tpu.matmul %113, %114, %cst_83 {dimension_numbers = #tpu.dot_dimension_numbers<[1], [0], [0], [1], [0, 0, 1, 1], [], []>} : vector<1x128xf32>, vector<128x128xf32>, vector<1x128xf32> -> vector<1x128xf32>
    %c0_84 = arith.constant 0 : index
    %c0_85 = arith.constant 0 : index
    %116 = vector.load %arg13[%c0_84, %c0_85] : memref<1x128xf32, #tpu.memory_space<vmem>>, vector<1x128xf32>
    %117 = arith.addf %115, %116 : vector<1x128xf32>
    %cst_86 = arith.constant 0.000000e+00 : f32
    %118 = vector.broadcast %cst_86 : f32 to vector<1x128xf32>
    %119 = arith.maximumf %117, %118 : vector<1x128xf32>
    %c0_87 = arith.constant 0 : index
    %c0_88 = arith.constant 0 : index
    %120 = vector.load %arg14[%c0_87, %c0_88] : memref<128x128xf32, #tpu.memory_space<vmem>>, vector<128x128xf32>
    %cst_89 = arith.constant dense<0.000000e+00> : vector<1x128xf32>
    %121 = tpu.matmul %119, %120, %cst_89 {dimension_numbers = #tpu.dot_dimension_numbers<[1], [0], [0], [1], [0, 0, 1, 1], [], []>} : vector<1x128xf32>, vector<128x128xf32>, vector<1x128xf32> -> vector<1x128xf32>
    %c0_90 = arith.constant 0 : index
    %c0_91 = arith.constant 0 : index
    %122 = vector.load %arg15[%c0_90, %c0_91] : memref<1x128xf32, #tpu.memory_space<vmem>>, vector<1x128xf32>
    %123 = arith.addf %121, %122 : vector<1x128xf32>
    %c0_92 = arith.constant 0 : index
    %c0_93 = arith.constant 0 : index
    %c0_94 = arith.constant 0 : index
    %124 = vector.load %arg16[%c0_92, %c0_93, %c0_94] : memref<1x1x128xf32, #tpu.memory_space<vmem>>, vector<1x1x128xf32>
    %125 = vector.shape_cast %124 : vector<1x1x128xf32> to vector<1x128xf32>
    %126 = vector.shape_cast %123 : vector<1x128xf32> to vector<1x1x128xf32>
    tpu.vector_store %arg16[%c0_92, %c0_93, %c0_94], %126 {strides = array<i32>} : memref<1x1x128xf32, #tpu.memory_space<vmem>>, vector<1x1x128xf32>,
    return
  }
  func.func @transform_0(%arg0: i32) -> (i32, i32, i32) {
    %c0_i32 = arith.constant 0 : i32
    %c0_i32_0 = arith.constant 0 : i32
    %c0_i32_1 = arith.constant 0 : i32
    return %arg0, %c0_i32, %c0_i32_0 : i32, i32, i32
  }
  func.func @transform_1(%arg0: i32) -> (i32, i32, i32) {
    %c0_i32 = arith.constant 0 : i32
    %c0_i32_0 = arith.constant 0 : i32
    %c0_i32_1 = arith.constant 0 : i32
    %c0_i32_2 = arith.constant 0 : i32
    return %c0_i32, %c0_i32_0, %c0_i32_1 : i32, i32, i32
  }
  func.func @transform_2(%arg0: i32) -> (i32, i32) {
    %c0_i32 = arith.constant 0 : i32
    %c0_i32_0 = arith.constant 0 : i32
    %c0_i32_1 = arith.constant 0 : i32
    return %c0_i32, %c0_i32_0 : i32, i32
  }
  func.func @transform_3(%arg0: i32) -> (i32, i32) {
    %c0_i32 = arith.constant 0 : i32
    %c0_i32_0 = arith.constant 0 : i32
    %c0_i32_1 = arith.constant 0 : i32
    return %c0_i32, %c0_i32_0 : i32, i32
  }
  func.func @transform_4(%arg0: i32) -> (i32, i32) {
    %c0_i32 = arith.constant 0 : i32
    %c0_i32_0 = arith.constant 0 : i32
    %c0_i32_1 = arith.constant 0 : i32
    return %c0_i32, %c0_i32_0 : i32, i32
  }
  func.func @transform_5(%arg0: i32) -> (i32, i32, i32) {
    %c0_i32 = arith.constant 0 : i32
    %c0_i32_0 = arith.constant 0 : i32
    %c0_i32_1 = arith.constant 0 : i32
    %c0_i32_2 = arith.constant 0 : i32
    return %c0_i32, %c0_i32_0, %c0_i32_1 : i32, i32, i32
  }
  func.func @transform_6(%arg0: i32) -> (i32, i32) {
    %c0_i32 = arith.constant 0 : i32
    %c0_i32_0 = arith.constant 0 : i32
    %c0_i32_1 = arith.constant 0 : i32
    return %c0_i32, %c0_i32_0 : i32, i32
  }
  func.func @transform_7(%arg0: i32) -> (i32, i32) {
    %c0_i32 = arith.constant 0 : i32
    %c0_i32_0 = arith.constant 0 : i32
    %c0_i32_1 = arith.constant 0 : i32
    return %c0_i32, %c0_i32_0 : i32, i32
  }
  func.func @transform_8(%arg0: i32) -> (i32, i32) {
    %c0_i32 = arith.constant 0 : i32
    %c0_i32_0 = arith.constant 0 : i32
    %c0_i32_1 = arith.constant 0 : i32
    return %c0_i32, %c0_i32_0 : i32, i32
  }
  func.func @transform_9(%arg0: i32) -> (i32, i32, i32) {
    %c0_i32 = arith.constant 0 : i32
    %c0_i32_0 = arith.constant 0 : i32
    %c0_i32_1 = arith.constant 0 : i32
    %c0_i32_2 = arith.constant 0 : i32
    return %c0_i32, %c0_i32_0, %c0_i32_1 : i32, i32, i32
  }
  func.func @transform_10(%arg0: i32) -> (i32, i32) {
    %c0_i32 = arith.constant 0 : i32
    %c0_i32_0 = arith.constant 0 : i32
    %c0_i32_1 = arith.constant 0 : i32
    return %c0_i32, %c0_i32_0 : i32, i32
  }
  func.func @transform_11(%arg0: i32) -> (i32, i32) {
    %c0_i32 = arith.constant 0 : i32
    %c0_i32_0 = arith.constant 0 : i32
    %c0_i32_1 = arith.constant 0 : i32
    return %c0_i32, %c0_i32_0 : i32, i32
  }
  func.func @transform_12(%arg0: i32) -> (i32, i32) {
    %c0_i32 = arith.constant 0 : i32
    %c0_i32_0 = arith.constant 0 : i32
    %c0_i32_1 = arith.constant 0 : i32
    return %c0_i32, %c0_i32_0 : i32, i32
  }
  func.func @transform_13(%arg0: i32) -> (i32, i32) {
    %c0_i32 = arith.constant 0 : i32
    %c0_i32_0 = arith.constant 0 : i32
    %c0_i32_1 = arith.constant 0 : i32
    return %c0_i32, %c0_i32_0 : i32, i32
  }
  func.func @transform_14(%arg0: i32) -> (i32, i32) {
    %c0_i32 = arith.constant 0 : i32
    %c0_i32_0 = arith.constant 0 : i32
    %c0_i32_1 = arith.constant 0 : i32
    return %c0_i32, %c0_i32_0 : i32, i32
  }
  func.func @transform_15(%arg0: i32) -> (i32, i32, i32) {
    %c0_i32 = arith.constant 0 : i32
    %c0_i32_0 = arith.constant 0 : i32
    %c0_i32_1 = arith.constant 0 : i32
    return %arg0, %c0_i32, %c0_i32_0 : i32, i32, i32
  }
}

</mosaic_0001>

<bundles_post_ra>
// kernel: cnn_forward.1
= control target key start
LH: loop header
LB: loop body
LE: loop exit
PB: predicated region body
PF: predicated region fallthrough
CT: control target
= control target key end

     0   :  { %20 = vsyncpa [#allocation3], 0  ;;  %s5164_s0 = inlined_call_operand.vmem [shape: f32[2,32,32], index: 0, kind: input, shape index: {}]   ;;  %s5165_s1 = inlined_call_operand.vmem [shape: f32[5,32,168], index: 1, kind: input, shape index: {}]   ;;  %s5166_s2 = inlined_call_operand.vmem [shape: f32[1,168], index: 2, kind: input, shape index: {}]   ;;  %s5167_s3 = inlined_call_operand.vmem [shape: f32[14,27], index: 3, kind: input, shape index: {}]   ;;  %s5168_s4 = inlined_call_operand.vmem [shape: f32[167,84], index: 4, kind: input, shape index: {}]   ;;  %s5169_s5 = inlined_call_operand.vmem [shape: f32[5,84,160], index: 5, kind: input, shape index: {}]   ;;  %s5170_s6 = inlined_call_operand.vmem [shape: f32[1,160], index: 6, kind: input, shape index: {}]   ;;  %s5171_s7 = inlined_call_operand.vmem [shape: f32[5,9], index: 7, kind: input, shape index: {}]   ;;  %s5172_s8 = inlined_call_operand.vmem [shape: f32[159,80], index: 8, kind: input, shape index: {}]   ;;  %s5173_s9 = inlined_call_operand.vmem [shape: f32[5,80,128], index: 9, kind: input, shape index: {}]   ;;  %s5174_s10 = inlined_call_operand.vmem [shape: f32[1,128], index: 10, kind: input, shape index: {}]   ;;  %s5175_s11 = inlined_call_operand.vmem [shape: f32[128,128], index: 11, kind: input, shape index: {}]   ;;  %s5176_s12 = inlined_call_operand.vmem [shape: f32[1,128], index: 12, kind: input, shape index: {}]   ;;  %s5177_s13 = inlined_call_operand.vmem [shape: f32[128,128], index: 13, kind: input, shape index: {}]   ;;  %s5178_s14 = inlined_call_operand.vmem [shape: f32[1,128], index: 14, kind: input, shape index: {}]   ;;  %s5179_s15 = inlined_call_operand.hbm [shape: f32[2,1,128], index: 15, kind: output, shape index: {}]  }
   0x1   :  { %22 = vsyncpa [#allocation3 + $0x1], 0  ;;  %s3932_s18 = smov 0   ;;  %s3934_s19 = smov 0  }
   0x2   :  { %s3936_s20 = smov 0   ;;  %s3938_s21 = smov 0  }
   0x3 LB: > { %5186 = sst [smem:[#allocation5_spill]] %s3832_s18  ;;  %s3953_s22 = sadd.s32 4294967295, %s3844_s21   ;;  %s3844_s21 = sphi %s3938_s21, %s5197_s21   ;;  %s3840_s20 = sphi %s3936_s20, %s5199_s20   ;;  %s3836_s19 = sphi %s3934_s19, %s5201_s19   ;;  %s3832_s18 = sphi %s3932_s18, %s5200_s18  }
   0x4   : > { %5187 = sst [smem:[#allocation6_spill]] %s3840_s20  ;;  %s2849_s23 = sadd.s32 4294967294, %s3844_s21  }
   0x5   : > { %5188 = sst [smem:[#allocation7_spill]] %s3844_s21  ;;  %s3957_s24 = sadd.s32 1, %s3844_s21  }
   0x6   : > { %5189 = sst [smem:[#allocation8_spill]] %s3957_s24  ;;  %s355_s25 = sadd.s32 1, %s3840_s20 }
   0x7   : > { %s352_s26 = ssub.s32 %s3844_s21, %s3957_s24  ;;  %p365_p0 = scmp.ne.s32.totalorder %s3840_s20, %s3836_s19 }
   0x8   : > { %p353_p1 = scmp.eq.s32.totalorder %s352_s26, 0  ;;  %p366_p2 = scmp.eq.s32.totalorder %s3953_s22, 1 }
   0x9   : > { %p371_p3 = scmp.ne.s32.totalorder %s3836_s19, %s3832_s18  ;;  %p372_p4 = scmp.eq.s32.totalorder %s2849_s23, 1 }
   0xa   : > { %s3968_s27 = scalar_select %p353_p1, %s3840_s20, %s355_s25  }
   0xb   : > { %p3970_p5 = por %p366_p2, %p365_p0  ;;  %p3974_p6 = por %p372_p4, %p371_p3 }
   0xc   : > { %5190 = sst [smem:[#allocation9_spill]] %s3968_s27  ;;  %p2852_p7 = scmp.ge.s32.totalorder %s3844_s21, 1 }
   0xd   : > { %s5192_s29 = scalar_select %p3974_p6, 1, 0 }
   0xe   : > { %p440_p8 = scmp.lt.s32.totalorder %s3844_s21, 3 }
   0xf   : > { %5193 = sst [smem:[#allocation10_spill]] %s5192_s29 }
  0x10   : > { %p441_p9 = pnand %p2852_p7, %p440_p8 }
  0x11   : > { %v2856_v0 = vld [vmem:[%s5165_s1 + $0x48] sm:$0xff] (!%p441_p9)  ;;  %v2858_v1 = vld [vmem:[%s5165_s1 + $0x58] sm:$0xff] (!%p441_p9)  ;;  %v2855_v2 = vld [vmem:[%s5165_s1 + $0x40] sm:$0xff] (!%p441_p9)  ;;  %p487_p10 = scmp.lt.s32.totalorder (!%p441_p9), %s3953_s22, 1  ;;  %v3846_v7 = vmov (!%p441_p9), 0.0   ;;  %vm517_vm0 = vcmask (!%p441_p9), 1046528  }
  0x12   : > { %444 = sbr.rel (%p441_p9) target bundleno = 2459 (0x99b), region = 80  ;;  %v3350_v3 = vpack.c.bf16 (!%p441_p9), %v2858_v1, %v2856_v0  ;;  %v2857_v4 = vld [vmem:[%s5165_s1 + $0x50] sm:$0xff] (!%p441_p9)  ;;  %v2860_v5 = vld [vmem:[%s5165_s1 + $0x68] sm:$0xff] (!%p441_p9)  ;;  %v2862_v6 = vld [vmem:[%s5165_s1 + $0x78] sm:$0xff] (!%p441_p9)  ;;  %598 = vmatprep.mubr.f32.mxu0 (!%p441_p9), %v3846_v7  ;;  %vm525_vm1 = vcmask (!%p441_p9), 261120   ;;  %vm973_vm2 = vcmask (!%p441_p9), 1043456  }
  0x13   : > { %v3352_v8 = vpack.c.bf16 (!%p441_p9), %v2857_v4, %v2855_v2  ;;  %v3354_v9 = vpack.c.bf16 (!%p441_p9), %v2862_v6, %v2860_v5  ;;  %v2859_v10 = vld [vmem:[%s5165_s1 + $0x60] sm:$0xff] (!%p441_p9)  ;;  %v2861_v11 = vld [vmem:[%s5165_s1 + $0x70] sm:$0xff] (!%p441_p9)  ;;  %v497_v12 = vld [vmem:[%s5165_s1 + $0x8] sm:$0xff] (!%p441_p9)  ;;  %vm729_vm3 = vcmask (!%p441_p9), 1045504   ;;  %vm851_vm4 = vcmask (!%p441_p9), 1044480   ;;  %s485_s25 = sand.u32 (!%p441_p9), 1, %s3836_s19  }
  0x14   : > { %3351 = vmatprep.subr.bf16.mxu0 (!%p441_p9), %v3350_v3  ;;  %v499_v13 = vld [vmem:[%s5165_s1 + $0x18] sm:$0xff] (!%p441_p9)  ;;  %v3356_v14 = vpack.c.bf16 (!%p441_p9), %v2861_v11, %v2859_v10  ;;  %v496_v15 = vld [vmem:[%s5165_s1] sm:$0xff] (!%p441_p9)  ;;  %v498_v17 = vld [vmem:[%s5165_s1 + $0x10] sm:$0xff] (!%p441_p9)  ;;  %vm1161_vm5 = vcmask (!%p441_p9), 1042432   ;;  %vm3847_vm6 = vmmov (!%p441_p9), 1   ;;  %vm1154_vm8 = vcmask (!%p441_p9), 220160  }
  0x15   : > { %3353 = vmatpush1.bf16.msra.mxu0 (!%p441_p9), %v3352_v8  ;;  %v3358_v16 = vpack.c.bf16 (!%p441_p9), %v499_v13, %v497_v12  ;;  %v501_v18 = vld [vmem:[%s5165_s1 + $0x28] sm:$0xff] (!%p441_p9)  ;;  %v503_v19 = vld [vmem:[%s5165_s1 + $0x38] sm:$0xff] (!%p441_p9)  ;;  %v3360_v26 = vpack.c.bf16 (!%p441_p9), %v498_v17, %v496_v15  ;;  %v500_v30 = vld [vmem:[%s5165_s1 + $0x20] sm:$0xff] (!%p441_p9)  ;;  %vm1257_vm9 = vcmask (!%p441_p9), 1039360   ;;  %vm1289_vm10 = vcmask (!%p441_p9), 318464   ;;  %s3072_s26 = sshll.u32 (!%p441_p9), %s3953_s22, 4 }
  0x16   : > { %3355 = vmatprep.subr.bf16.mxu0 (!%p441_p9), %v3354_v9  ;;  %v3362_v29 = vpack.c.bf16 (!%p441_p9), %v503_v19, %v501_v18  ;;  %v502_v31 = vld [vmem:[%s5165_s1 + $0x30] sm:$0xff] (!%p441_p9)  ;;  %v2872_v32 = vld [vmem:[%s5165_s1 + $0x88] sm:$0xff] (!%p441_p9)  ;;  %v2874_v33 = vld [vmem:[%s5165_s1 + $0x98] sm:$0xff] (!%p441_p9)  ;;  %vm1424_vm11 = vcmask (!%p441_p9), 687104   ;;  %vm1993_vm12 = vcmask (!%p441_p9), 1040384   ;;  %vm1989_vm14 = vcmask (!%p441_p9), 72704   ;;  %s5122_s21 = scalar_lea.hbm (!%p441_p9), %s5179_s15, %s3072_s26 }
  0x17   : > { %v3364_v36 = vpack.c.bf16 (!%p441_p9), %v502_v31, %v500_v30  ;;  %v3366_v37 = vpack.c.bf16 (!%p441_p9), %v2874_v33, %v2872_v32  ;;  %v2871_v46 = vld [vmem:[%s5165_s1 + $0x80] sm:$0xff] (!%p441_p9)  ;;  %v2873_v47 = vld [vmem:[%s5165_s1 + $0x90] sm:$0xff] (!%p441_p9)  ;;  %v2876_v48 = vld [vmem:[%s5165_s1 + $0xa8] sm:$0xff] (!%p441_p9)  ;;  %v1088_v31 = vlaneseq (!%p441_p9)  ;;  %s486_s30 = scalar_lea.vmem (!%p441_p9), [#allocation2], %s485_s25 }
  0x18   : > { %v2878_v49 = vld [vmem:[%s5165_s1 + $0xb8] sm:$0xff] (!%p441_p9)  ;;  %v3368_v50 = vpack.c.bf16 (!%p441_p9), %v2873_v47, %v2871_v46  ;;  %v2875_v52 = vld [vmem:[%s5165_s1 + $0xa0] sm:$0xff] (!%p441_p9)  ;;  %v2877_v53 = vld [vmem:[%s5165_s1 + $0xb0] sm:$0xff] (!%p441_p9) }
  0x19   : > { %s488_s27 = scalar_select %p487_p10, %s3953_s22, 1  ;;  %3357 = vmatpush1.bf16.msra.mxu0 %v3356_v14  ;;  %v3370_v51 = vpack.c.bf16 %v2878_v49, %v2876_v48  ;;  %v2884_v54 = vld [vmem:[%s5165_s1 + $0xc8] sm:$0xff]  ;;  %v2886_v55 = vld [vmem:[%s5165_s1 + $0xd8] sm:$0xff]  ;;  %v3372_v56 = vpack.c.bf16 %v2877_v53, %v2875_v52  ;;  %v2883_v60 = vld [vmem:[%s5165_s1 + $0xc0] sm:$0xff]  ;;  %v4199_v32 = vshrl.u32 %v1088_v31, 7 }
  0x1a   : > { %3359 = vmatprep.subr.bf16.mxu0 %v3358_v16  ;;  %v3374_v57 = vpack.c.bf16 %v2886_v55, %v2884_v54  ;;  %v2885_v61 = vld [vmem:[%s5165_s1 + $0xd0] sm:$0xff]  ;;  %v2888_v62 = vld [vmem:[%s5165_s1 + $0xe8] sm:$0xff]  ;;  %v2890_v63 = vld [vmem:[%s5165_s1 + $0xf8] sm:$0xff]  ;;  %s3851_s22 = smov [#allocation2]  }
  0x1b   : > { %s3075_s16 = sshll.u32 %s488_s27, 5  ;;  %v3376_v2 = vpack.c.bf16 %v2885_v61, %v2883_v60  ;;  %v3378_v3 = vpack.c.bf16 %v2890_v63, %v2888_v62  ;;  %v2887_v4 = vld [vmem:[%s5165_s1 + $0xe0] sm:$0xff]  ;;  %v2889_v5 = vld [vmem:[%s5165_s1 + $0xf0] sm:$0xff]  ;;  %v2896_v6 = vld [vmem:[%s5165_s1 + $0x108] sm:$0xff]  ;;  %v1090_v33 = vsub.s32 0, %v4199_v32  ;;  %s2794_s27 = sshll.u32 %s486_s30, 4  ;;  %s5124_s27 = int_to_ptr.vmem [resolvable:$true] %s2794_s27 }
  0x1c   : > { %s491_s20 = scalar_lea.vmem %s5164_s0, %s3075_s16  ;;  %v2898_v8 = vld [vmem:[%s5165_s1 + $0x118] sm:$0xff]  ;;  %v3380_v11 = vpack.c.bf16 %v2889_v5, %v2887_v4  ;;  %v2895_v16 = vld [vmem:[%s5165_s1 + $0x100] sm:$0xff]  ;;  %v2897_v17 = vld [vmem:[%s5165_s1 + $0x110] sm:$0xff]  ;;  %s2782_s16 = scalar_lea.sflag [#allocation3], %s485_s25 }
  0x1d   : > { %v4028_v20 = vld [vmem:[%s491_s20] sm:$0xff]  ;;  %v4030_v21 = vld [vmem:[%s491_s20 + $0x8] sm:$0xff]  ;;  %v4032_v22 = vld [vmem:[%s491_s20 + $0x10] sm:$0xff]  ;;  %v3382_v12 = vpack.c.bf16 %v2898_v8, %v2896_v6  ;;  %s3782_s17 = scalar_lea.vmem %s5124_s27, 16  ;;  %s3786_s23 = sshll.u32 %s3851_s22, 4  ;;  %s3787_s23 = int_to_ptr.vmem [resolvable:$false] %s3786_s23 }
  0x1e   : > { %v518_v23 = vrot.slane %v4028_v20, 1  ;;  %v519_v24 = vrot.slane %v4030_v21, 1  ;;  %v521_v25 = vrot.slane %v4032_v22, 1  ;;  %v4038_v28 = vld [vmem:[%s491_s20 + $0x18] sm:$0xff]  ;;  %v974_v38 = vrot.slane %v4028_v20, 4  ;;  %v2900_v18 = vld [vmem:[%s5165_s1 + $0x128] sm:$0xff]  ;;  %vm3395_vm7 = vmpackc.low %vm1161_vm5, %vm3847_vm6  ;;  %p3783_p11 = scmp.ne.s32.totalorder %s5124_s27, %s3782_s17  ;;  %p3789_p0 = scmp.lt.s32.totalorder %s5124_s27, %s3787_s23 }
  0x1f   : > { %v523_v35 = vrot.slane %v4038_v28, 1  ;;  %v975_v39 = vrot.slane %v4030_v21, 4  ;;  %v977_v40 = vrot.slane %v4032_v22, 4  ;;  %v979_v43 = vrot.slane %v4038_v28, 4  ;;  %v2902_v19 = vld [vmem:[%s5165_s1 + $0x138] sm:$0xff]  ;;  %s3849_s20 = smov 127   ;;  %vm3531_vm13 = vmpackc.low %vm1993_vm12, %vm3847_vm6 }
  0x20   : > { %v520_v27 = vsel %vm517_vm0, %v518_v23, %v519_v24  ;;  %v522_v34 = vsel %vm517_vm0, %v519_v24, %v521_v25  ;;  %v730_v58 = vrot.slane %v4028_v20, 2  ;;  %v731_v59 = vrot.slane %v4030_v21, 2  ;;  %vm3565_vm15 = vmpackc.low %vm517_vm0, %vm3847_vm6  ;;  %p3784_p12 = pnand %p3783_p11, %p3970_p5  ;;  %s3788_s24 = scalar_lea.vmem %s3787_s23, 32 }
  0x21   : > { %2863 = vmatmul.mubr.msk.f32.vlgmr.msra.gmra.mrb[0].mxu0 %vm525_vm1, %v520_v27  ;;  %v524_v41 = vsel %vm517_vm0, %v521_v25, %v523_v35  ;;  %v4063_v42 = vsel %vm973_vm2, %v974_v38, %v975_v39  ;;  %v4067_v44 = vsel %vm973_vm2, %v975_v39, %v977_v40  ;;  %v4072_v45 = vsel %vm973_vm2, %v977_v40, %v979_v43  ;;  %v2899_v25 = vld [vmem:[%s5165_s1 + $0x120] sm:$0xff]  ;;  %p3790_p1 = scmp.lt.s32.totalorder %s3788_s24, %s3782_s17 }
  0x22   : > { %604 = vmatprep.mubr.f32.mxu0 %v3846_v7  ;;  %3361 = vmatpush1.bf16.msra.mxu0 %v3360_v26  ;;  %v732_v0 = vsel %vm729_vm3, %v730_v58, %v731_v59  ;;  %v733_v1 = vrot.slane %v4032_v22, 2  ;;  %v735_v10 = vrot.slane %v4038_v28, 2  ;;  %v852_v14 = vrot.slane %v4028_v20, 3  ;;  %v2901_v26 = vld [vmem:[%s5165_s1 + $0x130] sm:$0xff]  ;;  %p3785_p13 = pneg %p3784_p12 }
  0x23   : > { %3363 = vmatprep.subr.bf16.mxu0 %v3362_v29  ;;  %v853_v15 = vrot.slane %v4030_v21, 3  ;;  %v3384_v23 = vpack.c.bf16 %v2897_v17, %v2895_v16  ;;  %v3386_v24 = vpack.c.bf16 %v2902_v19, %v2900_v18  ;;  %v857_v29 = vrot.slane %v4038_v28, 3  ;;  %p3791_p2 = por %p3790_p1, %p3789_p0 }
  0x24   : > { %v734_v9 = vsel %vm729_vm3, %v731_v59, %v733_v1  ;;  %v736_v13 = vsel %vm729_vm3, %v733_v1, %v735_v10 }
  0x25   : > { %2864 = vmatmul.mubr.msk.f32.gmra.mrb[2].mxu0 %vm525_vm1, %v522_v34  ;;  %v1086_v34 = vld [vmem:[%s5166_s2] sm:$0x3]  ;;  %p3792_p3 = pnand %p3791_p2, %p3785_p13 }
  0x26   : > { %610 = vmatprep.mubr.f32.mxu0 %v3846_v7  ;;  %3365 = vmatpush1.bf16.msra.mxu0 %v3364_v36  ;;  %v1091_v36 = vrot.slane %v1086_v34, %v1090_v33 }
  0x27   : > { %3367 = vmatprep.subr.bf16.mxu0 %v3366_v37 }
  0x29   : > { %2865 = vmatmul.mubr.msk.f32.gmra.mrb[4].mxu0 %vm525_vm1, %v524_v41 }
  0x2a   : > { %616 = vmatprep.mubr.f32.mxu0 %v3846_v7 }
  0x2d   : > { %2866 = vmatmul.mubr.msk.f32.gmra.mrb[6].mxu0 %vm525_vm1, %v523_v35  ;;  %v1094_v35 = vsub.s32 1, %v4199_v32 }
  0x2e   : > { %695 = vmatprep.mubr.f32.mxu0 %v3846_v7 }
  0x31   : > { %2867 = vmatmul.mubr.msk.f32.vlgmr.msra.gmra.mrb[0].mxu0 %vm525_vm1, %v4028_v20  ;;  %v854_v20 = vsel %vm851_vm4, %v852_v14, %v853_v15 }
  0x32   : > { %701 = vmatprep.mubr.f32.mxu0 %v3846_v7  ;;  %3369 = vmatpush1.bf16.msra.mxu0 %v3368_v50 }
  0x33   : > { %3371 = vmatprep.subr.bf16.mxu0 %v3370_v51 }
  0x35   : > { %2868 = vmatmul.mubr.msk.f32.gmra.mrb[2].mxu0 %vm525_vm1, %v4030_v21  ;;  %v855_v21 = vrot.slane %v4032_v22, 3 }
  0x36   : > { %707 = vmatprep.mubr.f32.mxu0 %v3846_v7  ;;  %3373 = vmatpush1.bf16.msra.mxu0 %v3372_v56 }
  0x37   : > { %3375 = vmatprep.subr.bf16.mxu0 %v3374_v57  ;;  %v856_v27 = vsel %vm851_vm4, %v853_v15, %v855_v21  ;;  %v858_v30 = vsel %vm851_vm4, %v855_v21, %v857_v29 }
  0x39   : > { %2869 = vmatmul.mubr.msk.f32.gmra.mrb[4].mxu0 %vm525_vm1, %v4032_v22  ;;  %v3388_v22 = vpack.c.bf16 %v2901_v26, %v2899_v25  ;;  %v1152_v25 = vld [vmem:[%s5167_s3] sm:$0xff]  ;;  %v1153_v26 = vld [vmem:[%s5167_s3 + $0x8] sm:$0x3f] }
  0x3a   : > { %713 = vmatprep.mubr.f32.mxu0 %v3846_v7 }
  0x3d   : > { %2870 = vmatmul.mubr.msk.f32.gmra.mrb[6].mxu0 %vm525_vm1, %v4038_v28  ;;  %v1095_v28 = vrot.slane %v1086_v34, %v1094_v35  ;;  %v1271_v34 = vld [vmem:[%s5168_s4 + $0x18] sm:$0xff] }
  0x3e   : > { %809 = vmatprep.mubr.f32.mxu0 %v3846_v7 }
  0x41   : > { %2879 = vmatmul.mubr.msk.f32.vlgmr.msra.gmra.mrb[0].mxu0 %vm525_vm1, %v732_v0 }
  0x42   : > { %815 = vmatprep.mubr.f32.mxu0 %v3846_v7  ;;  %3377 = vmatpush1.bf16.msra.mxu0 %v3376_v2 }
  0x43   : > { %3379 = vmatprep.subr.bf16.mxu0 %v3378_v3 }
  0x45   : > { %2880 = vmatmul.mubr.msk.f32.gmra.mrb[2].mxu0 %vm525_vm1, %v734_v9 }
  0x46   : > { %821 = vmatprep.mubr.f32.mxu0 %v3846_v7  ;;  %3381 = vmatpush1.bf16.msra.mxu0 %v3380_v11 }
  0x47   : > { %3383 = vmatprep.subr.bf16.mxu0 %v3382_v12 }
  0x49   : > { %2881 = vmatmul.mubr.msk.f32.gmra.mrb[4].mxu0 %vm525_vm1, %v736_v13 }
  0x4a   : > { %827 = vmatprep.mubr.f32.mxu0 %v3846_v7 }
  0x4d   : > { %2882 = vmatmul.mubr.msk.f32.gmra.mrb[6].mxu0 %vm525_vm1, %v735_v10 }
  0x4e   : > { %931 = vmatprep.mubr.f32.mxu0 %v3846_v7 }
  0x51   : > { %2891 = vmatmul.mubr.msk.f32.vlgmr.msra.gmra.mrb[0].mxu0 %vm525_vm1, %v854_v20 }
  0x52   : > { %937 = vmatprep.mubr.f32.mxu0 %v3846_v7  ;;  %3385 = vmatpush1.bf16.msra.mxu0 %v3384_v23 }
  0x53   : > { %3387 = vmatprep.subr.bf16.mxu0 %v3386_v24 }
  0x55   : > { %2892 = vmatmul.mubr.msk.f32.gmra.mrb[2].mxu0 %vm525_vm1, %v856_v27  ;;  %v1268_v27 = vld [vmem:[%s5168_s4] sm:$0xff] }
  0x56   : > { %943 = vmatprep.mubr.f32.mxu0 %v3846_v7  ;;  %3389 = vmatpush1.bf16.msra.mxu0 %v3388_v22  ;;  %v1270_v22 = vld [vmem:[%s5168_s4 + $0x10] sm:$0xff] }
  0x59   : > { %2893 = vmatmul.mubr.msk.f32.gmra.mrb[4].mxu0 %vm525_vm1, %v858_v30  ;;  %v3848_v30 = vmov 0.0|0.0  }
  0x5a   : > { %949 = vmatprep.mubr.f32.mxu0 %v3846_v7  ;;  %3400 = vmatprep.subr.bf16.mxu1 %v3848_v30 }
  0x5d   : > { %2894 = vmatmul.mubr.msk.f32.gmra.mrb[6].mxu0 %vm525_vm1, %v857_v29  ;;  %v1269_v29 = vld [vmem:[%s5168_s4 + $0x8] sm:$0xff] }
  0x5e   : > { %1053 = vmatprep.mubr.f32.mxu0 %v3846_v7  ;;  %v3401_v31 = vpack.c.bf16 %v1269_v29, %v1268_v27  ;;  %v2922_v29 = vld [vmem:[%s5169_s5 + $0xf0] sm:$0xff] }
  0x60   : > { %3402 = vmatpush1.bf16.msra.mxu1 %v3401_v31  ;;  %v2927_v31 = vld [vmem:[%s5169_s5 + $0x118] sm:$0xff] }
  0x61   : > { %2903 = vmatmul.mubr.msk.f32.vlgmr.msra.gmra.mrb[0].mxu0 %vm525_vm1, %v4063_v42  ;;  %3403 = vmatprep.subr.bf16.mxu1 %v3848_v30 }
  0x62   : > { %1059 = vmatprep.mubr.f32.mxu0 %v3846_v7 }
  0x65   : > { %2904 = vmatmul.mubr.msk.f32.gmra.mrb[2].mxu0 %vm525_vm1, %v4067_v44 }
  0x66   : > { %1065 = vmatprep.mubr.f32.mxu0 %v3846_v7 }
  0x69   : > { %2905 = vmatmul.mubr.msk.f32.gmra.mrb[4].mxu0 %vm525_vm1, %v4072_v45 }
  0x6a   : > { %1071 = vmatprep.mubr.f32.mxu0 %v3846_v7 }
  0x6d   : > { %2906 = vmatmul.mubr.msk.f32.gmra.mrb[6].mxu0 %vm525_vm1, %v979_v43  ;;  %vm3850_vm1 = vmmov 0  }
  0x6e   : > { %1232 = vmatprep.mubr.f32.mxu0 %v3846_v7 }
 0x134   : > { %v1055_v37 = vpop.f32.mrb[0].mxu0 }
 0x135   : > { %v1098_v38 = vadd.f32 %v1091_v36, %v1055_v37  ;;  %v1057_v39 = vpop.f32.mrb[1].mxu0  ;;  %v1273_v37 = vld [vmem:[%s5168_s4 + $0x28] sm:$0xff] }
 0x136   : > { %v1099_v40 = vadd.f32 %v1095_v28, %v1057_v39  ;;  %v1274_v39 = vld [vmem:[%s5168_s4 + $0x30] sm:$0xff] }
 0x137   : > { %v1106_v42 = vmax.f32 %v1098_v38, 0.0 }
 0x138   : > { %v1061_v41 = vpop.f32.mrb[2].mxu0  ;;  %v1107_v45 = vmax.f32 %v1099_v40, 0.0  ;;  %v1275_v40 = vld [vmem:[%s5168_s4 + $0x38] sm:$0xff] }
 0x139   : > { %v1100_v43 = vadd.f32 %v1091_v36, %v1061_v41  ;;  %v1063_v44 = vpop.f32.mrb[3].mxu0  ;;  %v1122_v50 = vrot.slane %v1106_v42, 1  ;;  %v3410_v41 = vpack.c.bf16 %v1275_v40, %v1274_v39  ;;  %v2931_v40 = vld [vmem:[%s5169_s5 + $0x138] sm:$0xff] }
 0x13a   : > { %v1101_v46 = vadd.f32 %v1095_v28, %v1063_v44  ;;  %v1125_v54 = vrot.slane %v1107_v45, 1 }
 0x13b   : > { %v1108_v47 = vmax.f32 %v1100_v43, 0.0  ;;  %v1277_v43 = vld [vmem:[%s5168_s4 + $0x48] sm:$0xff] }
 0x13c   : > { %v1109_v48 = vmax.f32 %v1101_v46, 0.0  ;;  %v1067_v49 = vpop.f32.mrb[4].mxu0  ;;  %v1279_v46 = vld [vmem:[%s5168_s4 + $0x58] sm:$0xff] }
 0x13d   : > { %v1123_v51 = vrot.slane %v1108_v47, 1  ;;  %v1102_v52 = vadd.f32 %v1091_v36, %v1067_v49  ;;  %v1069_v53 = vpop.f32.mrb[5].mxu0  ;;  %v1281_v49 = vld [vmem:[%s5168_s4 + $0x68] sm:$0xff] }
 0x13e   : > { %v1126_v55 = vrot.slane %v1109_v48, 1  ;;  %v1103_v56 = vadd.f32 %v1095_v28, %v1069_v53 }
 0x13f   : > { %v1124_v57 = vsel %vm517_vm0, %v1122_v50, %v1123_v51  ;;  %v1110_v58 = vmax.f32 %v1102_v52, 0.0  ;;  %v1283_v52 = vld [vmem:[%s5168_s4 + $0x78] sm:$0xff] }
 0x140   : > { %v1144_v59 = vmax.f32 %v1106_v42, %v1124_v57  ;;  %v1111_v60 = vmax.f32 %v1103_v56, 0.0  ;;  %v1073_v61 = vpop.f32.mrb[6].mxu0  ;;  %v1127_v62 = vsel %vm517_vm0, %v1125_v54, %v1126_v55  ;;  %v1276_v42 = vld [vmem:[%s5168_s4 + $0x40] sm:$0xff]  ;;  %v1286_v57 = vld [vmem:[%s5168_s4 + $0x90] sm:$0xff] }
 0x141   : > { %v1128_v63 = vrot.slane %v1110_v58, 1  ;;  %v1104_v0 = vadd.f32 %v1091_v36, %v1073_v61  ;;  %v1075_v1 = vpop.f32.mrb[7].mxu0  ;;  %v1145_v2 = vmax.f32 %v1107_v45, %v1127_v62  ;;  %v3404_v36 = vpack.c.bf16 %v1271_v34, %v1270_v22  ;;  %v1278_v45 = vld [vmem:[%s5168_s4 + $0x50] sm:$0xff]  ;;  %v1284_v54 = vld [vmem:[%s5168_s4 + $0x80] sm:$0xff]  ;;  %v2915_v61 = vld [vmem:[%s5169_s5 + $0xb8] sm:$0xff] }
 0x142   : > { %v1130_v3 = vrot.slane %v1111_v60, 1  ;;  %v1105_v4 = vadd.f32 %v1095_v28, %v1075_v1  ;;  %v1272_v28 = vld [vmem:[%s5168_s4 + $0x20] sm:$0xff]  ;;  %v3413_v44 = vpack.c.bf16 %v1277_v43, %v1276_v42  ;;  %v2917_v62 = vld [vmem:[%s5169_s5 + $0xc8] sm:$0xff]  ;;  %v2930_v43 = vld [vmem:[%s5169_s5 + $0x130] sm:$0xff] }
 0x143   : > { %v1129_v5 = vsel %vm517_vm0, %v1123_v51, %v1128_v63  ;;  %v1112_v6 = vmax.f32 %v1104_v0, 0.0  ;;  %3405 = vmatpush1.bf16.msra.mxu1 %v3404_v36  ;;  %v3407_v38 = vpack.c.bf16 %v1273_v37, %v1272_v28  ;;  %v1282_v51 = vld [vmem:[%s5168_s4 + $0x70] sm:$0xff]  ;;  %v3430_v0 = vpack.c.bf16 %v2917_v62, %v2915_v61  ;;  %v2924_v22 = vld [vmem:[%s5169_s5 + $0x100] sm:$0xff]  ;;  %v2929_v34 = vld [vmem:[%s5169_s5 + $0x128] sm:$0xff] }
 0x144   : > { %v1146_v8 = vmax.f32 %v1108_v47, %v1129_v5  ;;  %v1113_v9 = vmax.f32 %v1105_v4, 0.0  ;;  %v1131_v10 = vsel %vm517_vm0, %v1126_v55, %v1130_v3  ;;  %3406 = vmatprep.subr.bf16.mxu1 %v3848_v30  ;;  %v3416_v47 = vpack.c.bf16 %v1279_v46, %v1278_v45  ;;  %v1285_v55 = vld [vmem:[%s5168_s4 + $0x88] sm:$0xff]  ;;  %v2914_v5 = vld [vmem:[%s5169_s5 + $0xb0] sm:$0xff]  ;;  %v2935_v46 = vld [vmem:[%s5169_s5 + $0x158] sm:$0xf] }
 0x145   : > { %v1132_v11 = vrot.slane %v1112_v6, 1  ;;  %v1147_v12 = vmax.f32 %v1109_v48, %v1131_v10  ;;  %v1280_v48 = vld [vmem:[%s5168_s4 + $0x60] sm:$0xff]  ;;  %v3422_v53 = vpack.c.bf16 %v1283_v52, %v1282_v51  ;;  %v3425_v56 = vpack.c.bf16 %v1285_v55, %v1284_v54  ;;  %v2926_v37 = vld [vmem:[%s5169_s5 + $0x110] sm:$0xff] }
 0x146   : > { %v1134_v13 = vrot.slane %v1113_v9, 1  ;;  %v3392_v14 = vpack.c.bf16 %v1146_v8, %v1144_v59  ;;  %v3419_v50 = vpack.c.bf16 %v1281_v49, %v1280_v48  ;;  %v2919_v8 = vld [vmem:[%s5169_s5 + $0xd8] sm:$0xff]  ;;  %v3440_v36 = vpack.c.bf16 %v2924_v22, %v2922_v29  ;;  %v2934_v49 = vld [vmem:[%s5169_s5 + $0x150] sm:$0xf]  ;;  %v1374_v52 = vld [vmem:[%s5169_s5] sm:$0xff] }
 0x147   : > { %v1133_v15 = vsel %vm517_vm0, %v1128_v63, %v1132_v11  ;;  %v1150_v16 = vmax.f32 %v1112_v6, %v1132_v11  ;;  %v3390_v17 = vpack.c.bf16 %v1147_v12, %v1145_v2  ;;  %3408 = vmatpush1.bf16.msra.mxu1 %v3407_v38  ;;  %v2916_v6 = vld [vmem:[%s5169_s5 + $0xc0] sm:$0xff]  ;;  %v3442_v28 = vpack.c.bf16 %v2929_v34, %v2927_v31  ;;  %v1377_v48 = vld [vmem:[%s5169_s5 + $0x18] sm:$0xff]  ;;  %v1392_v31 = vld [vmem:[%s5169_s5 + $0x90] sm:$0xff] }
 0x148   : > { %v1148_v18 = vmax.f32 %v1110_v58, %v1133_v15  ;;  %v1135_v19 = vsel %vm517_vm0, %v1130_v3, %v1134_v13  ;;  %v1151_v20 = vmax.f32 %v1113_v9, %v1134_v13  ;;  %3409 = vmatprep.subr.bf16.mxu1 %v3848_v30  ;;  %v1287_v58 = vld [vmem:[%s5168_s4 + $0x98] sm:$0xff]  ;;  %v2921_v9 = vld [vmem:[%s5169_s5 + $0xe8] sm:$0xff]  ;;  %v2928_v38 = vld [vmem:[%s5169_s5 + $0x120] sm:$0xff] }
 0x149   : > { %v1149_v21 = vmax.f32 %v1111_v60, %v1135_v19  ;;  %3391 = vmatprep.subr.bf16.mxu0 %v3390_v17  ;;  %v3428_v59 = vpack.c.bf16 %v1287_v58, %v1286_v57  ;;  %v1288_v60 = vld [vmem:[%s5168_s4 + $0xa0] sm:$0x7f]  ;;  %v2918_v17 = vld [vmem:[%s5169_s5 + $0xd0] sm:$0xff]  ;;  %v2923_v19 = vld [vmem:[%s5169_s5 + $0xf8] sm:$0xff]  ;;  %v3444_v39 = vpack.c.bf16 %v2928_v38, %v2926_v37 }
 0x14a   : > { %v3397_v23 = vpack.c.bf16 %v1150_v16, %v1148_v18  ;;  %3393 = vmatpush1.bf16.msra.mxu0 %v3392_v14  ;;  %v3432_v14 = vpack.c.bf16 %v2916_v6, %v2914_v5  ;;  %v3434_v16 = vpack.c.bf16 %v2921_v9, %v2919_v8  ;;  %v2920_v18 = vld [vmem:[%s5169_s5 + $0xe0] sm:$0xff]  ;;  %v1381_v57 = vld [vmem:[%s5169_s5 + $0x38] sm:$0xff]  ;;  %v1380_v6 = vld [vmem:[%s5169_s5 + $0x30] sm:$0xff] }
 0x14b   : > { %v3394_v24 = vpack.c.bf16 %v1151_v20, %v1149_v21  ;;  %3411 = vmatpush1.bf16.msra.mxu1 %v3410_v41  ;;  %v2925_v20 = vld [vmem:[%s5169_s5 + $0x108] sm:$0xff]  ;;  %v1378_v5 = vld [vmem:[%s5169_s5 + $0x20] sm:$0xff]  ;;  %v2947_v37 = vld [vmem:[%s5169_s5 + $0x178] sm:$0xff] }
 0x14c   : > { %3412 = vmatprep.subr.bf16.mxu1 %v3848_v30  ;;  %v3438_v27 = vpack.c.bf16 %v2925_v20, %v2923_v19  ;;  %v2933_v41 = vld [vmem:[%s5169_s5 + $0x148] sm:$0xff]  ;;  %v1389_v19 = vld [vmem:[%s5169_s5 + $0x78] sm:$0xff]  ;;  %v1390_v22 = vld [vmem:[%s5169_s5 + $0x80] sm:$0xff] }
 0x14d   : > { %3396 = vmatprep.subr.msk.bf16.mxu0 %vm3395_vm7, %v3394_v24  ;;  %v3446_v42 = vpack.c.bf16 %v2933_v41, %v2931_v40  ;;  %v1383_v9 = vld [vmem:[%s5169_s5 + $0x48] sm:$0xff]  ;;  %v3468_v34 = vpack.c.bf16 %v1392_v31, %v1390_v22  ;;  %v2944_v38 = vld [vmem:[%s5169_s5 + $0x160] sm:$0xff]  ;;  %v2951_v41 = vld [vmem:[%s5169_s5 + $0x198] sm:$0xff] }
 0x14e   : > { %3399 = vmatpush1.bf16.msk.msra.mxu0 %vm3395_vm7, %v3397_v23  ;;  %v2949_v40 = vld [vmem:[%s5169_s5 + $0x188] sm:$0xff]  ;;  %v2978_v22 = vld [vmem:[%s5169_s5 + $0x250] sm:$0xff]  ;;  %v2980_v31 = vld [vmem:[%s5169_s5 + $0x260] sm:$0xff] }
 0x14f   : > { %3414 = vmatpush1.bf16.msra.mxu1 %v3413_v44  ;;  %v2932_v44 = vld [vmem:[%s5169_s5 + $0x140] sm:$0xff] }
 0x150   : > { %3415 = vmatprep.subr.bf16.mxu1 %v3848_v30  ;;  %v3448_v45 = vpack.c.bf16 %v2932_v44, %v2930_v43 }
 0x151   : > { %2909 = vmatmul.mubr.msk.f32.vlgmr.msra.gmra.mrb[8].mxu0 %vm1154_vm8, %v1152_v25  ;;  %v3436_v25 = vpack.c.bf16 %v2920_v18, %v2918_v17  ;;  %v1384_v17 = vld [vmem:[%s5169_s5 + $0x50] sm:$0xff]  ;;  %v1387_v18 = vld [vmem:[%s5169_s5 + $0x68] sm:$0xff] }
 0x152   : > { %1238 = vmatprep.mubr.f32.mxu0 %v3846_v7 }
 0x153   : > { %3417 = vmatpush1.bf16.msra.mxu1 %v3416_v47  ;;  %v1375_v47 = vld [vmem:[%s5169_s5 + $0x8] sm:$0xff] }
 0x154   : > { %3418 = vmatprep.subr.bf16.mxu1 %v3848_v30 }
 0x155   : > { %2910 = vmatmul.mubr.msk.f32.gmra.mrb[10].mxu0 %vm1154_vm8, %v1153_v26 }
 0x156   : > { %2064 = vmatprep.mubr.f32.mxu0 %v3846_v7 }
 0x157   : > { %3420 = vmatpush1.bf16.msra.mxu1 %v3419_v50  ;;  %v3450_v50 = vpack.c.bf16 %v1377_v48, %v1375_v47  ;;  %v2950_v47 = vld [vmem:[%s5169_s5 + $0x190] sm:$0xff]  ;;  %v2953_v48 = vld [vmem:[%s5169_s5 + $0x1a8] sm:$0xff] }
 0x158   : > { %3421 = vmatprep.subr.bf16.mxu1 %v3848_v30 }
 0x15b   : > { %3423 = vmatpush1.bf16.msra.mxu1 %v3422_v53  ;;  %v1376_v53 = vld [vmem:[%s5169_s5 + $0x10] sm:$0xff] }
 0x15c   : > { %3424 = vmatprep.subr.bf16.mxu1 %v3848_v30  ;;  %v3452_v55 = vpack.c.bf16 %v1376_v53, %v1374_v52  ;;  %v2952_v53 = vld [vmem:[%s5169_s5 + $0x1a0] sm:$0xff] }
 0x15f   : > { %3426 = vmatpush1.bf16.msra.mxu1 %v3425_v56  ;;  %v1379_v56 = vld [vmem:[%s5169_s5 + $0x28] sm:$0xff] }
 0x160   : > { %3427 = vmatprep.subr.bf16.mxu1 %v3848_v30 }
 0x163   : > { %3429 = vmatpush1.bf16.msra.mxu1 %v3428_v59 }
 0x164   : > { %1339 = vmatprep.subr.mxu1 %v3846_v7 }
 0x167   : > { %2911 = vmatpush1.msk.msra.mxu1 %vm517_vm0, %v1288_v60 }
 0x168   : > { %3431 = vmatprep.subr.bf16.mxu1 %v3430_v0 }
 0x224   : > { %v1234_v63 = vpop.f32.mrb[8].mxu0 }
 0x225   : > { %1249 = vrot.lane.b32.xlu0 %v1234_v63, %s3849_s20  ;;  %v1236_v1 = vpop.f32.mrb[9].mxu0 }
 0x228   : > { %v1240_v2 = vpop.f32.mrb[10].mxu0 }
 0x229   : > { %1251 = vrot.lane.b32.xlu0 %v1236_v1, %s3849_s20  ;;  %1253 = vrot.lane.b32.xlu1 %v1240_v2, %s3849_s20  ;;  %v1242_v3 = vpop.f32.mrb[11].mxu0 }
 0x22d   : > { %1255 = vrot.lane.b32.xlu1 %v1242_v3, %s3849_s20 }
 0x297   : > { %v1250_v4 = vpop.permute.xlu0 %1249 }
 0x29b   : > { %v1252_v10 = vpop.permute.xlu0 %1251  ;;  %v1254_v11 = vpop.permute.xlu1 %1253 }
 0x29c   : > { %v1258_v12 = vsel %vm1257_vm9, %v1250_v4, %v1252_v10  ;;  %v1265_v13 = vmax.f32 %v1236_v1, %v1252_v10  ;;  %v3454_v4 = vpack.c.bf16 %v1381_v57, %v1379_v56  ;;  %v1385_v10 = vld [vmem:[%s5169_s5 + $0x58] sm:$0xff] }
 0x29d   : > { %v1264_v15 = vmax.f32 %v1234_v63, %v1258_v12 }
 0x29e   : > { %2912 = vmatprep.mubr.msk.f32.mxu1 %vm1289_vm10, %v1265_v13 }
 0x29f   : > { %1364 = vmatmul.mubr.f32.vlgmr.msra.gmra.mrb[0].mxu1 %v1264_v15  ;;  %v1256_v21 = vpop.permute.xlu1 %1255  ;;  %v3458_v15 = vpack.c.bf16 %v1385_v10, %v1383_v9  ;;  %v2971_v9 = vld [vmem:[%s5169_s5 + $0x218] sm:$0xff]  ;;  %v2973_v10 = vld [vmem:[%s5169_s5 + $0x228] sm:$0xff] }
 0x2a0   : > { %v1259_v23 = vsel %vm1257_vm9, %v1254_v11, %v1256_v21  ;;  %v1267_v24 = vmax.f32 %v1242_v3, %v1256_v21  ;;  %3433 = vmatpush1.bf16.msra.mxu1 %v3432_v14  ;;  %v3456_v14 = vpack.c.bf16 %v1380_v6, %v1378_v5  ;;  %v3462_v21 = vpack.c.bf16 %v1389_v19, %v1387_v18  ;;  %v2962_v5 = vld [vmem:[%s5169_s5 + $0x1f0] sm:$0xff]  ;;  %v2964_v18 = vld [vmem:[%s5169_s5 + $0x200] sm:$0xf] }
 0x2a1   : > { %v1266_v26 = vmax.f32 %v1240_v2, %v1259_v23  ;;  %3435 = vmatprep.subr.bf16.mxu1 %v3434_v16  ;;  %v1382_v16 = vld [vmem:[%s5169_s5 + $0x40] sm:$0xff]  ;;  %v3490_v19 = vpack.c.bf16 %v2973_v10, %v2971_v9  ;;  %v3010_v9 = vld [vmem:[%s5169_s5 + $0x330] sm:$0xff]  ;;  %v3013_v10 = vld [vmem:[%s5169_s5 + $0x348] sm:$0xff] }
 0x2a2   : > { %2913 = vmatprep.mubr.msk.f32.mxu1 %vm1289_vm10, %v1267_v24  ;;  %v3460_v20 = vpack.c.bf16 %v1384_v17, %v1382_v16  ;;  %v1386_v23 = vld [vmem:[%s5169_s5 + $0x60] sm:$0xff]  ;;  %v1388_v24 = vld [vmem:[%s5169_s5 + $0x70] sm:$0xff]  ;;  %v2975_v16 = vld [vmem:[%s5169_s5 + $0x238] sm:$0xff] }
 0x2a3   : > { %1369 = vmatmul.mubr.f32.gmra.mrb[2].mxu1 %v1266_v26  ;;  %v1393_v26 = vld [vmem:[%s5169_s5 + $0x98] sm:$0xff]  ;;  %v2977_v17 = vld [vmem:[%s5169_s5 + $0x248] sm:$0xff] }
 0x2a4   : > { %3437 = vmatpush1.bf16.msra.mxu1 %v3436_v25  ;;  %1499 = vmatprep.mubr.f32.mxu1 %v3846_v7  ;;  %v1391_v25 = vld [vmem:[%s5169_s5 + $0x88] sm:$0xff] }
 0x2a5   : > { %3439 = vmatprep.subr.bf16.mxu1 %v3438_v27  ;;  %v3464_v27 = vpack.c.bf16 %v1388_v24, %v1386_v23  ;;  %v3466_v29 = vpack.c.bf16 %v1393_v26, %v1391_v25  ;;  %v2974_v23 = vld [vmem:[%s5169_s5 + $0x230] sm:$0xff]  ;;  %v2976_v24 = vld [vmem:[%s5169_s5 + $0x240] sm:$0xff]  ;;  %v2979_v25 = vld [vmem:[%s5169_s5 + $0x258] sm:$0xff] }
 0x2a6   : > { %v2981_v26 = vld [vmem:[%s5169_s5 + $0x268] sm:$0xff] }
 0x2a8   : > { %3441 = vmatpush1.bf16.msra.mxu1 %v3440_v36  ;;  %v1395_v36 = vld [vmem:[%s5169_s5 + $0xa8] sm:$0xf] }
 0x2a9   : > { %3443 = vmatprep.subr.bf16.mxu1 %v3442_v28  ;;  %v2945_v28 = vld [vmem:[%s5169_s5 + $0x168] sm:$0xff] }
 0x2aa   : > { %v3470_v43 = vpack.c.bf16 %v2947_v37, %v2945_v28  ;;  %v2982_v37 = vld [vmem:[%s5169_s5 + $0x270] sm:$0xff] }
 0x2ac   : > { %3445 = vmatpush1.bf16.msra.mxu1 %v3444_v39  ;;  %v2946_v39 = vld [vmem:[%s5169_s5 + $0x170] sm:$0xff] }
 0x2ad   : > { %3447 = vmatprep.subr.bf16.mxu1 %v3446_v42  ;;  %v1394_v42 = vld [vmem:[%s5169_s5 + $0xa0] sm:$0xf]  ;;  %v3472_v44 = vpack.c.bf16 %v2946_v39, %v2944_v38  ;;  %v2987_v39 = vld [vmem:[%s5169_s5 + $0x298] sm:$0xff] }
 0x2ae   : > { %v2984_v38 = vld [vmem:[%s5169_s5 + $0x280] sm:$0xff] }
 0x2b0   : > { %3449 = vmatpush1.bf16.msra.mxu1 %v3448_v45  ;;  %v3474_v45 = vpack.c.bf16 %v2951_v41, %v2949_v40  ;;  %v3504_v40 = vpack.c.bf16 %v2984_v38, %v2982_v37 }
 0x2b1   : > { %2936 = vmatprep.subr.msk.mxu1 %vm973_vm2, %v2935_v46  ;;  %v2948_v46 = vld [vmem:[%s5169_s5 + $0x180] sm:$0xff] }
 0x2b4   : > { %2937 = vmatpush1.msk.msra.mxu1 %vm973_vm2, %v2934_v49  ;;  %v2955_v49 = vld [vmem:[%s5169_s5 + $0x1b8] sm:$0xff] }
 0x2b5   : > { %3451 = vmatprep.subr.bf16.mxu1 %v3450_v50  ;;  %v3476_v50 = vpack.c.bf16 %v2950_v47, %v2948_v46  ;;  %v3478_v52 = vpack.c.bf16 %v2955_v49, %v2953_v48  ;;  %v2997_v46 = vld [vmem:[%s5169_s5 + $0x2c8] sm:$0xff]  ;;  %v2999_v47 = vld [vmem:[%s5169_s5 + $0x2d8] sm:$0xff]  ;;  %v2996_v48 = vld [vmem:[%s5169_s5 + $0x2c0] sm:$0xff] }
 0x2b6   : > { %v2998_v49 = vld [vmem:[%s5169_s5 + $0x2d0] sm:$0xff] }
 0x372   : > { %v4383_v51 = vpop.f32.mrb[0].mxu1 }
 0x373   : > { %v1367_v54 = vpop.f32.mrb[1].mxu1  ;;  %v1421_v58 = vrot.slane %v4383_v51, 1  ;;  %v1622_v59 = vrot.slane %v4383_v51, 2  ;;  %v1739_v60 = vrot.slane %v4383_v51, 3  ;;  %v1856_v61 = vrot.slane %v4383_v51, 4 }
 0x374   : > { %v2954_v54 = vld [vmem:[%s5169_s5 + $0x1b0] sm:$0xff] }
 0x375   : > { %v3480_v56 = vpack.c.bf16 %v2954_v54, %v2952_v53  ;;  %v2990_v53 = vld [vmem:[%s5169_s5 + $0x2b0] sm:$0xf]  ;;  %v3510_v54 = vpack.c.bf16 %v2999_v47, %v2997_v46  ;;  %v2083_v46 = vld [vmem:[%s5172_s8 + $0x8] sm:$0xff] }
 0x376   : > { %v4401_v62 = vpop.f32.mrb[2].mxu1  ;;  %v2084_v47 = vld [vmem:[%s5172_s8 + $0x10] sm:$0xff] }
 0x377   : > { %v1422_v63 = vrot.slane %v4401_v62, 1  ;;  %v1623_v0 = vrot.slane %v4401_v62, 2  ;;  %v1740_v1 = vrot.slane %v4401_v62, 3  ;;  %v1857_v2 = vrot.slane %v4401_v62, 4  ;;  %v1372_v3 = vpop.f32.mrb[3].mxu1 }
 0x379   : > { %v1423_v8 = vsel %vm517_vm0, %v1421_v58, %v1422_v63  ;;  %v4423_v11 = vsel %vm729_vm3, %v1622_v59, %v1623_v0  ;;  %v4428_v12 = vsel %vm851_vm4, %v1739_v60, %v1740_v1  ;;  %v4433_v13 = vsel %vm973_vm2, %v1856_v61, %v1857_v2  ;;  %v2956_v58 = vld [vmem:[%s5169_s5 + $0x1c0] sm:$0xff]  ;;  %v2958_v59 = vld [vmem:[%s5169_s5 + $0x1d0] sm:$0xff]  ;;  %v2961_v60 = vld [vmem:[%s5169_s5 + $0x1e8] sm:$0xff] }
 0x37a   : > { %2938 = vmatmul.mubr.msk.f32.vlgmr.msra.gmra.mrb[4].mxu1 %vm1424_vm11, %v1423_v8  ;;  %v2963_v61 = vld [vmem:[%s5169_s5 + $0x1f8] sm:$0xff]  ;;  %v2965_v8 = vld [vmem:[%s5169_s5 + $0x208] sm:$0xf] }
 0x37b   : > { %3453 = vmatpush1.bf16.msra.mxu1 %v3452_v55  ;;  %1505 = vmatprep.mubr.f32.mxu1 %v3846_v7  ;;  %v2957_v55 = vld [vmem:[%s5169_s5 + $0x1c8] sm:$0xff]  ;;  %v3486_v3 = vpack.c.bf16 %v2963_v61, %v2961_v60 }
 0x37c   : > { %3455 = vmatprep.subr.bf16.mxu1 %v3454_v4  ;;  %v2960_v4 = vld [vmem:[%s5169_s5 + $0x1e0] sm:$0xff] }
 0x37d   : > { %v3488_v6 = vpack.c.bf16 %v2962_v5, %v2960_v4  ;;  %v3009_v4 = vld [vmem:[%s5169_s5 + $0x328] sm:$0xff] }
 0x37e   : > { %2939 = vmatmul.mubr.msk.f32.gmra.mrb[6].mxu1 %vm1424_vm11, %v1422_v63  ;;  %v3484_v63 = vpack.c.bf16 %v2958_v59, %v2956_v58  ;;  %v3005_v58 = vld [vmem:[%s5169_s5 + $0x308] sm:$0xff]  ;;  %v3007_v59 = vld [vmem:[%s5169_s5 + $0x318] sm:$0xff] }
 0x37f   : > { %3457 = vmatpush1.bf16.msra.mxu1 %v3456_v14  ;;  %1586 = vmatprep.mubr.f32.mxu1 %v3846_v7  ;;  %v2970_v14 = vld [vmem:[%s5169_s5 + $0x210] sm:$0xff]  ;;  %v3518_v61 = vpack.c.bf16 %v3007_v59, %v3005_v58  ;;  %v2091_v58 = vld [vmem:[%s5172_s8 + $0x48] sm:$0xff] }
 0x380   : > { %3459 = vmatprep.subr.bf16.mxu1 %v3458_v15  ;;  %v2972_v15 = vld [vmem:[%s5169_s5 + $0x220] sm:$0xff] }
 0x383   : > { %3461 = vmatpush1.bf16.msra.mxu1 %v3460_v20  ;;  %v3492_v20 = vpack.c.bf16 %v2972_v15, %v2970_v14 }
 0x384   : > { %3463 = vmatprep.subr.bf16.mxu1 %v3462_v21  ;;  %v3494_v21 = vpack.c.bf16 %v2977_v17, %v2975_v16  ;;  %v3012_v16 = vld [vmem:[%s5169_s5 + $0x340] sm:$0xff]  ;;  %v3014_v17 = vld [vmem:[%s5169_s5 + $0x350] sm:$0xff] }
 0x387   : > { %3465 = vmatpush1.bf16.msra.mxu1 %v3464_v27  ;;  %v3496_v27 = vpack.c.bf16 %v2976_v24, %v2974_v23 }
 0x388   : > { %3467 = vmatprep.subr.bf16.mxu1 %v3466_v29  ;;  %v3498_v29 = vpack.c.bf16 %v2981_v26, %v2979_v25 }
 0x38b   : > { %3469 = vmatpush1.bf16.msra.mxu1 %v3468_v34  ;;  %v2983_v34 = vld [vmem:[%s5169_s5 + $0x278] sm:$0xff] }
 0x38c   : > { %2940 = vmatprep.subr.msk.mxu1 %vm973_vm2, %v1395_v36  ;;  %v3500_v36 = vpack.c.bf16 %v2980_v31, %v2978_v22 }
 0x38f   : > { %2941 = vmatpush1.msk.msra.mxu1 %vm973_vm2, %v1394_v42  ;;  %v2986_v42 = vld [vmem:[%s5169_s5 + $0x290] sm:$0xff] }
 0x390   : > { %2942 = vmatmul.mubr.msk.f32.vlgmr.msra.gmra.mrb[4].mxu1 %vm1424_vm11, %v4383_v51  ;;  %3471 = vmatprep.subr.bf16.mxu1 %v3470_v43  ;;  %v2959_v51 = vld [vmem:[%s5169_s5 + $0x1d8] sm:$0xff]  ;;  %v2988_v43 = vld [vmem:[%s5169_s5 + $0x2a0] sm:$0xff] }
 0x391   : > { %3473 = vmatpush1.bf16.msra.mxu1 %v3472_v44  ;;  %1592 = vmatprep.mubr.f32.mxu1 %v3846_v7  ;;  %v3482_v57 = vpack.c.bf16 %v2959_v51, %v2957_v55  ;;  %v3508_v44 = vpack.c.bf16 %v2988_v43, %v2986_v42  ;;  %v3512_v55 = vpack.c.bf16 %v2998_v49, %v2996_v48  ;;  %v2085_v49 = vld [vmem:[%s5172_s8 + $0x18] sm:$0xff] }
 0x392   : > { %3475 = vmatprep.subr.bf16.mxu1 %v3474_v45  ;;  %v2991_v45 = vld [vmem:[%s5169_s5 + $0x2b8] sm:$0xf] }
 0x394   : > { %2943 = vmatmul.mubr.msk.f32.gmra.mrb[6].mxu1 %vm1424_vm11, %v4401_v62 }
 0x395   : > { %3477 = vmatpush1.bf16.msra.mxu1 %v3476_v50  ;;  %1699 = vmatprep.mubr.f32.mxu1 %v3846_v7  ;;  %v3001_v50 = vld [vmem:[%s5169_s5 + $0x2e8] sm:$0xff] }
 0x396   : > { %3479 = vmatprep.subr.bf16.mxu1 %v3478_v52  ;;  %v3003_v52 = vld [vmem:[%s5169_s5 + $0x2f8] sm:$0xff] }
 0x397   : > { %v3514_v51 = vpack.c.bf16 %v3003_v52, %v3001_v50  ;;  %v3540_v50 = vpack.c.bf16 %v2085_v49, %v2084_v47  ;;  %v2086_v52 = vld [vmem:[%s5172_s8 + $0x20] sm:$0xff]  ;;  %v3035_v47 = vld [vmem:[%s5173_s9 + $0x90] sm:$0xff] }
 0x399   : > { %3481 = vmatpush1.bf16.msra.mxu1 %v3480_v56  ;;  %v3000_v56 = vld [vmem:[%s5169_s5 + $0x2e0] sm:$0xff] }
 0x39a   : > { %3483 = vmatprep.subr.bf16.mxu1 %v3482_v57  ;;  %v3002_v57 = vld [vmem:[%s5169_s5 + $0x2f0] sm:$0xff] }
 0x39b   : > { %v3516_v60 = vpack.c.bf16 %v3002_v57, %v3000_v56  ;;  %v2090_v57 = vld [vmem:[%s5172_s8 + $0x40] sm:$0xff] }
 0x39c   : > { %v3549_v59 = vpack.c.bf16 %v2091_v58, %v2090_v57  ;;  %v2181_v57 = vld [vmem:[%s5173_s9 + $0x10] sm:$0xff] }
 0x39d   : > { %3485 = vmatpush1.bf16.msra.mxu1 %v3484_v63  ;;  %v3004_v63 = vld [vmem:[%s5169_s5 + $0x300] sm:$0xff] }
 0x39e   : > { %3487 = vmatprep.subr.bf16.mxu1 %v3486_v3  ;;  %v3006_v3 = vld [vmem:[%s5169_s5 + $0x310] sm:$0xff] }
 0x39f   : > { %v3520_v5 = vpack.c.bf16 %v3006_v3, %v3004_v63  ;;  %v2094_v3 = vld [vmem:[%s5172_s8 + $0x60] sm:$0xff] }
 0x3a1   : > { %3489 = vmatpush1.bf16.msra.mxu1 %v3488_v6 }
 0x3a2   : > { %2966 = vmatprep.subr.msk.mxu1 %vm973_vm2, %v2965_v8  ;;  %v3008_v8 = vld [vmem:[%s5169_s5 + $0x320] sm:$0xff] }
 0x3a3   : > { %v3524_v14 = vpack.c.bf16 %v3010_v9, %v3008_v8  ;;  %v2098_v9 = vld [vmem:[%s5172_s8 + $0x80] sm:$0xff] }
 0x3a5   : > { %2967 = vmatpush1.msk.msra.mxu1 %vm973_vm2, %v2964_v18  ;;  %v3528_v18 = vpack.c.bf16 %v3014_v17, %v3012_v16  ;;  %v3039_v17 = vld [vmem:[%s5173_s9 + $0xa0] sm:$0xff] }
 0x3a6   : > { %2968 = vmatmul.mubr.msk.f32.vlgmr.msra.gmra.mrb[4].mxu1 %vm1424_vm11, %v4423_v11  ;;  %3491 = vmatprep.subr.bf16.mxu1 %v3490_v19  ;;  %v2985_v11 = vld [vmem:[%s5169_s5 + $0x288] sm:$0xff] }
 0x3a7   : > { %3493 = vmatpush1.bf16.msra.mxu1 %v3492_v20  ;;  %1705 = vmatprep.mubr.f32.mxu1 %v3846_v7  ;;  %v3502_v28 = vpack.c.bf16 %v2985_v11, %v2983_v34  ;;  %v3017_v19 = vld [vmem:[%s5169_s5 + $0x368] sm:$0xf]  ;;  %v3016_v20 = vld [vmem:[%s5169_s5 + $0x360] sm:$0xf] }
 0x3a8   : > { %3495 = vmatprep.subr.bf16.mxu1 %v3494_v21  ;;  %v1950_v21 = vld [vmem:[%s5170_s6] sm:$0x3] }
 0x3a9   : > { %v1955_v23 = vrot.slane %v1950_v21, %v1090_v33  ;;  %v1959_v24 = vrot.slane %v1950_v21, %v1094_v35  ;;  %v3042_v21 = vld [vmem:[%s5173_s9 + $0xb8] sm:$0xff] }
 0x3aa   : > { %2969 = vmatmul.mubr.msk.f32.gmra.mrb[6].mxu1 %vm1424_vm11, %v1623_v0  ;;  %v2989_v0 = vld [vmem:[%s5169_s5 + $0x2a8] sm:$0xff] }
 0x3ab   : > { %3497 = vmatpush1.bf16.msra.mxu1 %v3496_v27  ;;  %1816 = vmatprep.mubr.f32.mxu1 %v3846_v7  ;;  %v3506_v41 = vpack.c.bf16 %v2989_v0, %v2987_v39 }
 0x3ac   : > { %3499 = vmatprep.subr.bf16.mxu1 %v3498_v29 }
 0x3af   : > { %3501 = vmatpush1.bf16.msra.mxu1 %v3500_v36 }
 0x3b0   : > { %3503 = vmatprep.subr.bf16.mxu1 %v3502_v28 }
 0x3b3   : > { %3505 = vmatpush1.bf16.msra.mxu1 %v3504_v40 }
 0x3b4   : > { %3507 = vmatprep.subr.bf16.mxu1 %v3506_v41 }
 0x3b7   : > { %3509 = vmatpush1.bf16.msra.mxu1 %v3508_v44  ;;  %v1988_v44 = vld [vmem:[%s5171_s7] sm:$0x1f] }
 0x3b8   : > { %2992 = vmatprep.subr.msk.mxu1 %vm973_vm2, %v2991_v45  ;;  %v2082_v45 = vld [vmem:[%s5172_s8] sm:$0xff] }
 0x3b9   : > { %v3537_v48 = vpack.c.bf16 %v2083_v46, %v2082_v45  ;;  %v3034_v45 = vld [vmem:[%s5173_s9 + $0x88] sm:$0xff] }
 0x3bb   : > { %2993 = vmatpush1.msk.msra.mxu1 %vm973_vm2, %v2990_v53  ;;  %v2087_v53 = vld [vmem:[%s5172_s8 + $0x28] sm:$0xff] }
 0x3bc   : > { %2994 = vmatmul.mubr.msk.f32.vlgmr.msra.gmra.mrb[4].mxu1 %vm1424_vm11, %v4428_v12  ;;  %3511 = vmatprep.subr.bf16.mxu1 %v3510_v54  ;;  %v3011_v12 = vld [vmem:[%s5169_s5 + $0x338] sm:$0xff]  ;;  %v3543_v54 = vpack.c.bf16 %v2087_v53, %v2086_v52  ;;  %v2180_v52 = vld [vmem:[%s5173_s9 + $0x8] sm:$0xff]  ;;  %v3061_v53 = vld [vmem:[%s5173_s9 + $0x140] sm:$0xff] }
 0x3bd   : > { %3513 = vmatpush1.bf16.msra.mxu1 %v3512_v55  ;;  %1822 = vmatprep.mubr.f32.mxu1 %v3846_v7  ;;  %v3522_v6 = vpack.c.bf16 %v3011_v12, %v3009_v4  ;;  %v2088_v55 = vld [vmem:[%s5172_s8 + $0x30] sm:$0xff]  ;;  %v2095_v4 = vld [vmem:[%s5172_s8 + $0x68] sm:$0xff] }
 0x3be   : > { %3515 = vmatprep.subr.bf16.mxu1 %v3514_v51  ;;  %v2089_v51 = vld [vmem:[%s5172_s8 + $0x38] sm:$0xff]  ;;  %v3555_v12 = vpack.c.bf16 %v2095_v4, %v2094_v3 }
 0x3bf   : > { %v3546_v56 = vpack.c.bf16 %v2089_v51, %v2088_v55  ;;  %v3064_v3 = vld [vmem:[%s5173_s9 + $0x158] sm:$0xff] }
 0x3c0   : > { %2995 = vmatmul.mubr.msk.f32.gmra.mrb[6].mxu1 %vm1424_vm11, %v1740_v1  ;;  %v3015_v1 = vld [vmem:[%s5169_s5 + $0x358] sm:$0xff] }
 0x3c1   : > { %3517 = vmatpush1.bf16.msra.mxu1 %v3516_v60  ;;  %1933 = vmatprep.mubr.f32.mxu1 %v3846_v7  ;;  %v3526_v15 = vpack.c.bf16 %v3015_v1, %v3013_v10  ;;  %v2092_v60 = vld [vmem:[%s5172_s8 + $0x50] sm:$0xff]  ;;  %v2099_v10 = vld [vmem:[%s5172_s8 + $0x88] sm:$0xff] }
 0x3c2   : > { %3519 = vmatprep.subr.bf16.mxu1 %v3518_v61  ;;  %v2093_v61 = vld [vmem:[%s5172_s8 + $0x58] sm:$0xff]  ;;  %v3561_v1 = vpack.c.bf16 %v2099_v10, %v2098_v9  ;;  %v3066_v9 = vld [vmem:[%s5173_s9 + $0x168] sm:$0xff] }
 0x3c3   : > { %v3552_v63 = vpack.c.bf16 %v2093_v61, %v2092_v60  ;;  %v2182_v61 = vld [vmem:[%s5173_s9 + $0x18] sm:$0xff] }
 0x3c4   : > { %v3586_v4 = vpack.c.bf16 %v2182_v61, %v2181_v57  ;;  %v2618_v57 = vld [vmem:[%s5175_s11 + $0x68] sm:$0xff] }
 0x3c5   : > { %3521 = vmatpush1.bf16.msra.mxu1 %v3520_v5  ;;  %v2096_v5 = vld [vmem:[%s5172_s8 + $0x70] sm:$0xff] }
 0x3c6   : > { %3523 = vmatprep.subr.bf16.mxu1 %v3522_v6  ;;  %v2097_v6 = vld [vmem:[%s5172_s8 + $0x78] sm:$0xff] }
 0x3c7   : > { %v3558_v8 = vpack.c.bf16 %v2097_v6, %v2096_v5  ;;  %v2183_v5 = vld [vmem:[%s5173_s9 + $0x20] sm:$0xff]  ;;  %v2184_v6 = vld [vmem:[%s5173_s9 + $0x28] sm:$0xff] }
 0x3c8   : > { %v3589_v10 = vpack.c.bf16 %v2184_v6, %v2183_v5  ;;  %v2696_v5 = vld [vmem:[%s5177_s13 + $0x18] sm:$0xff] }
 0x3c9   : > { %3525 = vmatpush1.bf16.msra.mxu1 %v3524_v14  ;;  %v2100_v14 = vld [vmem:[%s5172_s8 + $0x90] sm:$0xff] }
 0x3ca   : > { %3527 = vmatprep.subr.bf16.mxu1 %v3526_v15  ;;  %v2101_v15 = vld [vmem:[%s5172_s8 + $0x98] sm:$0x7f] }
 0x3cb   : > { %v3564_v16 = vpack.c.bf16 %v2101_v15, %v2100_v14  ;;  %v2185_v14 = vld [vmem:[%s5173_s9 + $0x30] sm:$0xff]  ;;  %v2186_v15 = vld [vmem:[%s5173_s9 + $0x38] sm:$0xff] }
 0x3cd   : > { %3529 = vmatpush1.bf16.msra.mxu1 %v3528_v18  ;;  %v3040_v18 = vld [vmem:[%s5173_s9 + $0xa8] sm:$0xff] }
 0x3ce   : > { %3018 = vmatprep.subr.msk.mxu1 %vm973_vm2, %v3017_v19  ;;  %v3598_v19 = vpack.c.bf16 %v3040_v18, %v3039_v17  ;;  %v3068_v17 = vld [vmem:[%s5173_s9 + $0x178] sm:$0xff]  ;;  %v3592_v18 = vpack.c.bf16 %v2186_v15, %v2185_v14 }
 0x3cf   : > { %v2700_v14 = vld [vmem:[%s5177_s13 + $0x38] sm:$0xff] }
 0x3d1   : > { %3019 = vmatpush1.msk.msra.mxu1 %vm973_vm2, %v3016_v20  ;;  %v3041_v20 = vld [vmem:[%s5173_s9 + $0xb0] sm:$0xff]  ;;  %vm2202_vm2 = vcmask 654336  }
 0x3d2   : > { %3020 = vmatmul.mubr.msk.f32.vlgmr.msra.gmra.mrb[4].mxu1 %vm1424_vm11, %v4433_v13  ;;  %3597 = vmatprep.subr.bf16.mxu1 %v3848_v30 }
 0x3d3   : > { %1939 = vmatprep.mubr.f32.mxu1 %v3846_v7  ;;  %3599 = vmatpush3.bf16.msra.mxu1 %v3598_v19 }
 0x3d4   : > { %3600 = vmatprep.subr.bf16.mxu1 %v3848_v30 }
 0x3d6   : > { %3021 = vmatmul.mubr.msk.f32.gmra.mrb[6].mxu1 %vm1424_vm11, %v1857_v2 }
 0x3d7   : > { %3231 = vmatprep.mubr.msk.f32.mxu1 %vm3850_vm1, %v3846_v7 }
 0x4a5   : > { %v1935_v25 = vpop.f32.mrb[4].mxu1 }
 0x4a6   : > { %v1962_v13 = vadd.f32 %v1955_v23, %v1935_v25  ;;  %v1937_v26 = vpop.f32.mrb[5].mxu1 }
 0x4a7   : > { %v1963_v27 = vadd.f32 %v1959_v24, %v1937_v26  ;;  %v3044_v26 = vld [vmem:[%s5173_s9 + $0xc8] sm:$0xff] }
 0x4a8   : > { %v1966_v22 = vmax.f32 %v1962_v13, 0.0  ;;  %v3043_v13 = vld [vmem:[%s5173_s9 + $0xc0] sm:$0xff] }
 0x4a9   : > { %v1941_v29 = vpop.f32.mrb[6].mxu1  ;;  %v1967_v34 = vmax.f32 %v1963_v27, 0.0  ;;  %v3604_v27 = vpack.c.bf16 %v3044_v26, %v3043_v13  ;;  %v3050_v26 = vld [vmem:[%s5173_s9 + $0xf0] sm:$0xff] }
 0x4aa   : > { %v1964_v31 = vadd.f32 %v1955_v23, %v1941_v29  ;;  %v1943_v62 = vpop.f32.mrb[7].mxu1  ;;  %v1974_v28 = vrot.slane %v1966_v22, 1  ;;  %v3601_v23 = vpack.c.bf16 %v3042_v21, %v3041_v20  ;;  %v3045_v29 = vld [vmem:[%s5173_s9 + $0xd0] sm:$0xff]  ;;  %v2187_v20 = vld [vmem:[%s5173_s9 + $0x40] sm:$0xff]  ;;  %v2188_v21 = vld [vmem:[%s5173_s9 + $0x48] sm:$0xff] }
 0x4ab   : > { %v1965_v2 = vadd.f32 %v1959_v24, %v1943_v62  ;;  %v1977_v38 = vrot.slane %v1967_v34, 1  ;;  %v3047_v62 = vld [vmem:[%s5173_s9 + $0xe0] sm:$0xff] }
 0x4ac   : > { %v1968_v11 = vmax.f32 %v1964_v31, 0.0  ;;  %3602 = vmatpush3.bf16.msra.mxu1 %v3601_v23  ;;  %v3069_v23 = vld [vmem:[%s5173_s9 + $0x180] sm:$0xff] }
 0x4ad   : > { %v1969_v36 = vmax.f32 %v1965_v2, 0.0  ;;  %3603 = vmatprep.subr.bf16.mxu1 %v3848_v30 }
 0x4ae   : > { %v1975_v37 = vrot.slane %v1968_v11, 1 }
 0x4af   : > { %v1978_v39 = vrot.slane %v1969_v36, 1 }
 0x4b0   : > { %v1976_v33 = vsel %vm517_vm0, %v1974_v28, %v1975_v37  ;;  %v1986_v32 = vmax.f32 %v1968_v11, %v1975_v37  ;;  %3605 = vmatpush3.bf16.msra.mxu1 %v3604_v27  ;;  %v3027_v11 = vld [vmem:[%s5173_s9 + $0x50] sm:$0xff]  ;;  %v3051_v27 = vld [vmem:[%s5173_s9 + $0xf8] sm:$0xff] }
 0x4b1   : > { %v1984_v35 = vmax.f32 %v1966_v22, %v1976_v33  ;;  %v1979_v0 = vsel %vm517_vm0, %v1977_v38, %v1978_v39  ;;  %v1987_v40 = vmax.f32 %v1969_v36, %v1978_v39  ;;  %3606 = vmatprep.subr.bf16.mxu1 %v3848_v30  ;;  %v3046_v22 = vld [vmem:[%s5173_s9 + $0xd8] sm:$0xff]  ;;  %vm2102_vm0 = vcmask 252928  }
 0x4b2   : > { %v1985_v41 = vmax.f32 %v1967_v34, %v1979_v0  ;;  %v3607_v31 = vpack.c.bf16 %v3046_v22, %v3045_v29  ;;  %v3048_v34 = vld [vmem:[%s5173_s9 + $0xe8] sm:$0xff]  ;;  %v3028_v36 = vld [vmem:[%s5173_s9 + $0x58] sm:$0xff]  ;;  %v3613_v29 = vpack.c.bf16 %v3051_v27, %v3050_v26 }
 0x4b3   : > { %v3533_v42 = vpack.c.bf16 %v1986_v32, %v1984_v35  ;;  %v3610_v2 = vpack.c.bf16 %v3048_v34, %v3047_v62  ;;  %v3568_v33 = vpack.c.bf16 %v3028_v36, %v3027_v11  ;;  %v3029_v35 = vld [vmem:[%s5173_s9 + $0x60] sm:$0xff]  ;;  %v3030_v0 = vld [vmem:[%s5173_s9 + $0x68] sm:$0xff]  ;;  %v3055_v11 = vld [vmem:[%s5173_s9 + $0x118] sm:$0xff] }
 0x4b4   : > { %v3530_v43 = vpack.c.bf16 %v1987_v40, %v1985_v41  ;;  %3608 = vmatpush3.bf16.msra.mxu1 %v3607_v31  ;;  %v3571_v40 = vpack.c.bf16 %v3030_v0, %v3029_v35  ;;  %v3031_v41 = vld [vmem:[%s5173_s9 + $0x70] sm:$0xff]  ;;  %v3052_v31 = vld [vmem:[%s5173_s9 + $0x100] sm:$0xff]  ;;  %v3053_v62 = vld [vmem:[%s5173_s9 + $0x108] sm:$0xff] }
 0x4b5   : > { %3609 = vmatprep.subr.bf16.mxu1 %v3848_v30  ;;  %v3616_v34 = vpack.c.bf16 %v3053_v62, %v3052_v31  ;;  %v2605_v0 = vld [vmem:[%s5175_s11] sm:$0xff] }
 0x4b6   : > { %3532 = vmatprep.subr.msk.bf16.mxu0 %vm3531_vm13, %v3530_v43 }
 0x4b7   : > { %3535 = vmatpush1.bf16.msk.msra.mxu0 %vm3531_vm13, %v3533_v42  ;;  %v3032_v42 = vld [vmem:[%s5173_s9 + $0x78] sm:$0xff] }
 0x4b8   : > { %3536 = vmatprep.subr.bf16.mxu0 %v3848_v30  ;;  %3611 = vmatpush3.bf16.msra.mxu1 %v3610_v2  ;;  %v3574_v43 = vpack.c.bf16 %v3032_v42, %v3031_v41  ;;  %v3054_v2 = vld [vmem:[%s5173_s9 + $0x110] sm:$0xff] }
 0x4b9   : > { %3627 = vmatprep.subr.bf16.mxu1 %v3848_v30  ;;  %v3619_v36 = vpack.c.bf16 %v3055_v11, %v3054_v2  ;;  %v2607_v42 = vld [vmem:[%s5175_s11 + $0x10] sm:$0xff] }
 0x4ba   : > { %3024 = vmatmul.mubr.msk.f32.vlgmr.msra.gmra.mrb[12].mxu0 %vm1989_vm14, %v1988_v44  ;;  %v3033_v44 = vld [vmem:[%s5173_s9 + $0x80] sm:$0xff] }
 0x4bb   : > { %3538 = vmatpush1.bf16.msra.mxu0 %v3537_v48  ;;  %v3577_v46 = vpack.c.bf16 %v3034_v45, %v3033_v44  ;;  %v3036_v48 = vld [vmem:[%s5173_s9 + $0x98] sm:$0xff]  ;;  %v2609_v44 = vld [vmem:[%s5175_s11 + $0x20] sm:$0xff]  ;;  %v2610_v45 = vld [vmem:[%s5175_s11 + $0x28] sm:$0xff] }
 0x4bc   : > { %3539 = vmatprep.subr.bf16.mxu0 %v3848_v30  ;;  %v3580_v49 = vpack.c.bf16 %v3036_v48, %v3035_v47  ;;  %v2611_v47 = vld [vmem:[%s5175_s11 + $0x30] sm:$0xff]  ;;  %v2612_v48 = vld [vmem:[%s5175_s11 + $0x38] sm:$0xff] }
 0x4bf   : > { %3541 = vmatpush1.bf16.msra.mxu0 %v3540_v50  ;;  %v2179_v50 = vld [vmem:[%s5173_s9] sm:$0xff] }
 0x4c0   : > { %3542 = vmatprep.subr.bf16.mxu0 %v3848_v30  ;;  %v3583_v51 = vpack.c.bf16 %v2180_v52, %v2179_v50  ;;  %v2613_v50 = vld [vmem:[%s5175_s11 + $0x40] sm:$0xff]  ;;  %v2614_v52 = vld [vmem:[%s5175_s11 + $0x48] sm:$0xff] }
 0x4c3   : > { %3544 = vmatpush1.bf16.msra.mxu0 %v3543_v54  ;;  %v3062_v54 = vld [vmem:[%s5173_s9 + $0x148] sm:$0xff] }
 0x4c4   : > { %3545 = vmatprep.subr.bf16.mxu0 %v3848_v30 }
 0x4c7   : > { %3547 = vmatpush1.bf16.msra.mxu0 %v3546_v56  ;;  %v3628_v56 = vpack.c.bf16 %v3062_v54, %v3061_v53  ;;  %v3655_v53 = vpack.c.bf16 %v2614_v52, %v2613_v50  ;;  %v2615_v54 = vld [vmem:[%s5175_s11 + $0x50] sm:$0xff] }
 0x4c8   : > { %3548 = vmatprep.subr.bf16.mxu0 %v3848_v30 }
 0x4cb   : > { %3550 = vmatpush1.bf16.msra.mxu0 %v3549_v59 }
 0x4cc   : > { %3551 = vmatprep.subr.bf16.mxu0 %v3848_v30 }
 0x4cf   : > { %3553 = vmatpush1.bf16.msra.mxu0 %v3552_v63  ;;  %v3063_v63 = vld [vmem:[%s5173_s9 + $0x150] sm:$0xff] }
 0x4d0   : > { %3554 = vmatprep.subr.bf16.mxu0 %v3848_v30 }
 0x4d3   : > { %3556 = vmatpush1.bf16.msra.mxu0 %v3555_v12  ;;  %v3631_v12 = vpack.c.bf16 %v3064_v3, %v3063_v63  ;;  %v2693_v63 = vld [vmem:[%s5177_s13] sm:$0xff]  ;;  %v2694_v3 = vld [vmem:[%s5177_s13 + $0x8] sm:$0xff] }
 0x4d4   : > { %3557 = vmatprep.subr.bf16.mxu0 %v3848_v30 }
 0x4d7   : > { %3559 = vmatpush1.bf16.msra.mxu0 %v3558_v8  ;;  %v3065_v8 = vld [vmem:[%s5173_s9 + $0x160] sm:$0xff] }
 0x4d8   : > { %3560 = vmatprep.subr.bf16.mxu0 %v3848_v30 }
 0x4db   : > { %3562 = vmatpush1.bf16.msra.mxu0 %v3561_v1  ;;  %v3634_v1 = vpack.c.bf16 %v3066_v9, %v3065_v8  ;;  %v2697_v8 = vld [vmem:[%s5177_s13 + $0x20] sm:$0xff]  ;;  %v2698_v9 = vld [vmem:[%s5177_s13 + $0x28] sm:$0xff] }
 0x4dc   : > { %3563 = vmatprep.subr.bf16.mxu0 %v3848_v30 }
 0x4df   : > { %3566 = vmatpush1.bf16.msk.msra.mxu0 %vm3565_vm15, %v3564_v16  ;;  %v3067_v16 = vld [vmem:[%s5173_s9 + $0x170] sm:$0xff] }
 0x4e0   : > { %3567 = vmatprep.subr.bf16.mxu0 %v3848_v30  ;;  %v3637_v19 = vpack.c.bf16 %v3068_v17, %v3067_v16  ;;  %v2701_v16 = vld [vmem:[%s5177_s13 + $0x40] sm:$0xff]  ;;  %v2702_v17 = vld [vmem:[%s5177_s13 + $0x48] sm:$0xff] }
 0x58d   : > { %v2066_v24 = vpop.f32.mrb[12].mxu0 }
 0x58e   : > { %v2068_v25 = vpop.f32.mrb[13].mxu0  ;;  %2073 = vrot.lane.b32.xlu0 %v2066_v24, %s3849_s20 }
 0x58f   : > { %2075 = vrot.lane.b32.xlu1 %v2068_v25, %s3849_s20 }
 0x600   : > { %v2074_v28 = vpop.permute.xlu0 %2073 }
 0x601   : > { %v2076_v37 = vpop.permute.xlu1 %2075 }
 0x602   : > { %v2077_v38 = vsel %vm1257_vm9, %v2074_v28, %v2076_v37  ;;  %v2081_v39 = vmax.f32 %v2068_v25, %v2076_v37  ;;  %v3595_v25 = vpack.c.bf16 %v2188_v21, %v2187_v20  ;;  %v3056_v28 = vld [vmem:[%s5173_s9 + $0x120] sm:$0xff]  ;;  %v3057_v37 = vld [vmem:[%s5173_s9 + $0x128] sm:$0xff]  ;;  %v2704_v20 = vld [vmem:[%s5177_s13 + $0x58] sm:$0xff] }
 0x603   : > { %v2080_v32 = vmax.f32 %v2066_v24, %v2077_v38  ;;  %v3070_v24 = vld [vmem:[%s5173_s9 + $0x188] sm:$0xff]  ;;  %v3622_v38 = vpack.c.bf16 %v3057_v37, %v3056_v28 }
 0x604   : > { %3026 = vmatprep.mubr.msk.f32.mxu0 %vm2102_vm0, %v2081_v39  ;;  %v3640_v13 = vpack.c.bf16 %v3070_v24, %v3069_v23  ;;  %v3058_v39 = vld [vmem:[%s5173_s9 + $0x130] sm:$0xff]  ;;  %v2705_v23 = vld [vmem:[%s5177_s13 + $0x60] sm:$0xff]  ;;  %v2706_v24 = vld [vmem:[%s5177_s13 + $0x68] sm:$0xff] }
 0x605   : > { %2174 = vmatmul.mubr.f32.vlgmr.msra.gmra.mrb[14].mxu0 %v2080_v32 }
 0x606   : > { %3569 = vmatpush3.bf16.msra.mxu0 %v3568_v33  ;;  %3185 = vmatprep.mubr.msk.f32.mxu0 %vm3850_vm1, %v3846_v7  ;;  %v3059_v33 = vld [vmem:[%s5173_s9 + $0x138] sm:$0xff] }
 0x607   : > { %3570 = vmatprep.subr.bf16.mxu0 %v3848_v30  ;;  %v3625_v32 = vpack.c.bf16 %v3059_v33, %v3058_v39 }
 0x60a   : > { %3572 = vmatpush3.bf16.msra.mxu0 %v3571_v40  ;;  %v2606_v40 = vld [vmem:[%s5175_s11 + $0x8] sm:$0xff] }
 0x60b   : > { %3573 = vmatprep.subr.bf16.mxu0 %v3848_v30  ;;  %v3643_v41 = vpack.c.bf16 %v2606_v40, %v2605_v0  ;;  %v2621_v40 = vld [vmem:[%s5176_s12] sm:$0x1] }
 0x60e   : > { %3575 = vmatpush3.bf16.msra.mxu0 %v3574_v43 }
 0x60f   : > { %3576 = vmatprep.subr.bf16.mxu0 %v3848_v30 }
 0x612   : > { %3578 = vmatpush3.bf16.msra.mxu0 %v3577_v46  ;;  %v3649_v46 = vpack.c.bf16 %v2610_v45, %v2609_v44  ;;  %v2709_v44 = vld [vmem:[%s5178_s14] sm:$0x1] }
 0x613   : > { %3579 = vmatprep.subr.bf16.mxu0 %v3848_v30 }
 0x616   : > { %3581 = vmatpush3.bf16.msra.mxu0 %v3580_v49  ;;  %v3652_v49 = vpack.c.bf16 %v2612_v48, %v2611_v47 }
 0x617   : > { %3582 = vmatprep.subr.bf16.mxu0 %v3848_v30 }
 0x6d8   : > { %v4883_v55 = vpop.f32.mrb[14].mxu0 }
 0x6d9   : > { %v2201_v58 = vrot.slane %v4883_v55, 1  ;;  %v2358_v59 = vrot.slane %v4883_v55, 2  ;;  %v2177_v60 = vpop.f32.mrb[15].mxu0  ;;  %v2528_v22 = vrot.slane %v4883_v55, 4  ;;  %v2443_v35 = vrot.slane %v4883_v55, 3 }
 0x6da   : > { %v2620_v60 = vld [vmem:[%s5175_s11 + $0x78] sm:$0xff] }
 0x6db   : > { %3186 = vmatmul.mubr.msk.f32.vlgmr.msra.gmra.mrb[16].mxu0 %vm2202_vm2, %v2201_v58  ;;  %3232 = vmatmul.mubr.msk.f32.vlgmr.msra.gmra.mrb[8].mxu1 %vm2202_vm2, %v2358_v59  ;;  %v2619_v59 = vld [vmem:[%s5175_s11 + $0x70] sm:$0xff] }
 0x6dc   : > { %3584 = vmatpush3.bf16.msra.mxu0 %v3583_v51  ;;  %3629 = vmatpush3.bf16.msra.mxu1 %v3628_v56  ;;  %v2617_v56 = vld [vmem:[%s5175_s11 + $0x60] sm:$0xff]  ;;  %v3664_v61 = vpack.c.bf16 %v2620_v60, %v2619_v59 }
 0x6dd   : > { %3585 = vmatprep.subr.bf16.mxu0 %v3848_v30  ;;  %3630 = vmatprep.subr.bf16.mxu1 %v3848_v30  ;;  %v3661_v58 = vpack.c.bf16 %v2618_v57, %v2617_v56 }
 0x6de   : > { %3208 = vmatprep.mubr.msk.f32.mxu0 %vm3850_vm1, %v3846_v7  ;;  %3277 = vmatprep.mubr.msk.f32.mxu1 %vm3850_vm1, %v3846_v7 }
 0x6e0   : > { %3587 = vmatpush3.bf16.msra.mxu0 %v3586_v4  ;;  %3632 = vmatpush3.bf16.msra.mxu1 %v3631_v12  ;;  %v2695_v4 = vld [vmem:[%s5177_s13 + $0x10] sm:$0xff]  ;;  %v3667_v12 = vpack.c.bf16 %v2694_v3, %v2693_v63 }
 0x6e1   : > { %3588 = vmatprep.subr.bf16.mxu0 %v3848_v30  ;;  %3633 = vmatprep.subr.bf16.mxu1 %v3848_v30  ;;  %v3670_v6 = vpack.c.bf16 %v2696_v5, %v2695_v4 }
 0x6e4   : > { %3590 = vmatpush3.bf16.msra.mxu0 %v3589_v10  ;;  %3635 = vmatpush3.bf16.msra.mxu1 %v3634_v1  ;;  %v3673_v10 = vpack.c.bf16 %v2698_v9, %v2697_v8  ;;  %v2699_v1 = vld [vmem:[%s5177_s13 + $0x30] sm:$0xff] }
 0x6e5   : > { %3591 = vmatprep.subr.bf16.mxu0 %v3848_v30  ;;  %3636 = vmatprep.subr.bf16.mxu1 %v3848_v30  ;;  %v3676_v15 = vpack.c.bf16 %v2700_v14, %v2699_v1 }
 0x6e8   : > { %3593 = vmatpush3.bf16.msra.mxu0 %v3592_v18  ;;  %3638 = vmatpush3.bf16.msra.mxu1 %v3637_v19  ;;  %v3679_v18 = vpack.c.bf16 %v2702_v17, %v2701_v16  ;;  %v2703_v19 = vld [vmem:[%s5177_s13 + $0x50] sm:$0xff] }
 0x6e9   : > { %3594 = vmatprep.subr.bf16.mxu0 %v3848_v30  ;;  %3639 = vmatprep.subr.bf16.mxu1 %v3848_v30  ;;  %v3682_v21 = vpack.c.bf16 %v2704_v20, %v2703_v19 }
 0x6ec   : > { %3596 = vmatpush3.bf16.msra.mxu0 %v3595_v25  ;;  %3641 = vmatpush3.bf16.msra.mxu1 %v3640_v13  ;;  %v3685_v25 = vpack.c.bf16 %v2706_v24, %v2705_v23 }
 0x6ed   : > { %3612 = vmatprep.subr.bf16.mxu0 %v3848_v30  ;;  %3666 = vmatprep.subr.bf16.mxu1 %v3848_v30 }
 0x6ef   : > { %3209 = vmatmul.mubr.msk.f32.vlgmr.msra.gmra.mrb[18].mxu0 %vm2202_vm2, %v4883_v55  ;;  %3278 = vmatmul.mubr.msk.f32.vlgmr.msra.gmra.mrb[10].mxu1 %vm2202_vm2, %v2528_v22  ;;  %v2616_v55 = vld [vmem:[%s5175_s11 + $0x58] sm:$0xff] }
 0x6f0   : > { %3614 = vmatpush3.bf16.msra.mxu0 %v3613_v29  ;;  %3254 = vmatprep.mubr.msk.f32.mxu0 %vm3850_vm1, %v3846_v7  ;;  %v3658_v51 = vpack.c.bf16 %v2616_v55, %v2615_v54 }
 0x6f1   : > { %3615 = vmatprep.subr.bf16.mxu0 %v3848_v30  ;;  %3347 = vmatprep.mubr.msk.f32.mxu1 %vm3850_vm1, %v3846_v7 }
 0x6f2   : > { %3668 = vmatpush3.bf16.msra.mxu1 %v3667_v12 }
 0x6f3   : > { %3669 = vmatprep.subr.bf16.mxu1 %v3848_v30 }
 0x6f4   : > { %3617 = vmatpush3.bf16.msra.mxu0 %v3616_v34 }
 0x6f5   : > { %3618 = vmatprep.subr.bf16.mxu0 %v3848_v30 }
 0x6f6   : > { %3671 = vmatpush3.bf16.msra.mxu1 %v3670_v6 }
 0x6f7   : > { %3672 = vmatprep.subr.bf16.mxu1 %v3848_v30 }
 0x6f8   : > { %3620 = vmatpush3.bf16.msra.mxu0 %v3619_v36 }
 0x6f9   : > { %3621 = vmatprep.subr.bf16.mxu0 %v3848_v30 }
 0x6fa   : > { %3674 = vmatpush3.bf16.msra.mxu1 %v3673_v10 }
 0x6fb   : > { %3675 = vmatprep.subr.bf16.mxu1 %v3848_v30 }
 0x6fc   : > { %3623 = vmatpush3.bf16.msra.mxu0 %v3622_v38  ;;  %v2602_v38 = vld [vmem:[%s5174_s10] sm:$0x1] }
 0x6fd   : > { %3624 = vmatprep.subr.bf16.mxu0 %v3848_v30 }
 0x6fe   : > { %3677 = vmatpush3.bf16.msra.mxu1 %v3676_v15 }
 0x6ff   : > { %3678 = vmatprep.subr.bf16.mxu1 %v3848_v30 }
 0x700   : > { %3626 = vmatpush3.bf16.msra.mxu0 %v3625_v32  ;;  %v2707_v32 = vld [vmem:[%s5177_s13 + $0x70] sm:$0xff] }
 0x701   : > { %3642 = vmatprep.subr.bf16.mxu0 %v3848_v30 }
 0x702   : > { %3680 = vmatpush3.bf16.msra.mxu1 %v3679_v18 }
 0x703   : > { %3255 = vmatmul.mubr.msk.f32.vlgmr.msra.gmra.mrb[20].mxu0 %vm2202_vm2, %v2443_v35  ;;  %3681 = vmatprep.subr.bf16.mxu1 %v3848_v30  ;;  %v2708_v35 = vld [vmem:[%s5177_s13 + $0x78] sm:$0xff] }
 0x704   : > { %3312 = vmatprep.mubr.msk.f32.mxu0 %vm3850_vm1, %v3846_v7  ;;  %3644 = vmatpush3.bf16.msra.mxu0 %v3643_v41  ;;  %v2608_v7 = vld [vmem:[%s5175_s11 + $0x18] sm:$0xff]  ;;  %v3688_v0 = vpack.c.bf16 %v2708_v35, %v2707_v32 }
 0x705   : > { %3645 = vmatprep.subr.bf16.mxu0 %v3848_v30  ;;  %v3646_v43 = vpack.c.bf16 %v2608_v7, %v2607_v42 }
 0x706   : > { %3683 = vmatpush3.bf16.msra.mxu1 %v3682_v21 }
 0x707   : > { %3684 = vmatprep.subr.bf16.mxu1 %v3848_v30 }
 0x708   : > { %3647 = vmatpush3.bf16.msra.mxu0 %v3646_v43 }
 0x709   : > { %3648 = vmatprep.subr.bf16.mxu0 %v3848_v30 }
 0x70a   : > { %3686 = vmatpush3.bf16.msra.mxu1 %v3685_v25 }
 0x70b   : > { %3687 = vmatprep.subr.bf16.mxu1 %v3848_v30 }
 0x70c   : > { %3650 = vmatpush3.bf16.msra.mxu0 %v3649_v46 }
 0x70d   : > { %3651 = vmatprep.subr.bf16.mxu0 %v3848_v30 }
 0x70e   : > { %3689 = vmatpush3.bf16.msra.mxu1 %v3688_v0 }
 0x710   : > { %3653 = vmatpush3.bf16.msra.mxu0 %v3652_v49 }
 0x711   : > { %3654 = vmatprep.subr.bf16.mxu0 %v3848_v30 }
 0x714   : > { %3656 = vmatpush3.bf16.msra.mxu0 %v3655_v53 }
 0x715   : > { %3657 = vmatprep.subr.bf16.mxu0 %v3848_v30 }
 0x718   : > { %3659 = vmatpush3.bf16.msra.mxu0 %v3658_v51 }
 0x719   : > { %3660 = vmatprep.subr.bf16.mxu0 %v3848_v30 }
 0x71c   : > { %3662 = vmatpush3.bf16.msra.mxu0 %v3661_v58 }
 0x71d   : > { %3663 = vmatprep.subr.bf16.mxu0 %v3848_v30 }
 0x720   : > { %3665 = vmatpush3.bf16.msra.mxu0 %v3664_v61 }
 0x7ae   : > { %v2271_v13 = vpop.f32.mrb[16].mxu0  ;;  %v2427_v26 = vpop.f32.mrb[8].mxu1 }
 0x7af   : > { %v3187_v27 = vpop.f32.mrb[17].mxu0  ;;  %v3233_v29 = vpop.f32.mrb[9].mxu1 }
 0x7c2   : > { %v2343_v22 = vpop.f32.mrb[18].mxu0  ;;  %v2597_v31 = vpop.f32.mrb[10].mxu1 }
 0x7c3   : > { %v2344_v62 = vadd.f32 %v2343_v22, %v2271_v13  ;;  %v3210_v34 = vpop.f32.mrb[19].mxu0  ;;  %v3279_v2 = vpop.f32.mrb[11].mxu1 }
 0x7c5   : > { %v2431_v11 = vadd.f32 %v2427_v26, %v2344_v62 }
 0x7d6   : > { %v2512_v36 = vpop.f32.mrb[20].mxu0 }
 0x7d7   : > { %v2516_v28 = vadd.f32 %v2512_v36, %v2431_v11  ;;  %v3256_v37 = vpop.f32.mrb[21].mxu0 }
 0x7d9   : > { %v2601_v39 = vadd.f32 %v2597_v31, %v2516_v28 }
 0x7db   : > { %v2603_v30 = vadd.f32 %v2602_v38, %v2601_v39 }
 0x7dd   : > { %v2604_v33 = vmax.f32 %v2603_v30, 0.0 }
 0x7df   : > { %3313 = vmatmul.mubr.f32.vlgmr.msra.gmra.mrb[22].mxu0 %v2604_v33 }
 0x8b2   : > { %v2688_v41 = vpop.f32.mrb[22].mxu0 }
 0x8b3   : > { %v2689_v42 = vadd.f32 %v2688_v41, %v2621_v40  ;;  %v3314_v7 = vpop.f32.mrb[23].mxu0 }
 0x8b5   : > { %v2692_v43 = vmax.f32 %v2689_v42, 0.0 }
 0x8b7   : > { %3348 = vmatmul.mubr.f32.vlgmr.msra.gmra.mrb[12].mxu1 %v2692_v43 }
 0x98a   : > { %v2776_v45 = vpop.f32.mrb[12].mxu1 }
 0x98b   : > { %v2777_v46 = vadd.f32 %v2776_v45, %v2709_v44  ;;  %v3349_v47 = vpop.f32.mrb[13].mxu1 }
 0x98d   : > { %2780 = vst [vmem:[%s486_s30] sm:$0x1] %v2777_v46 }
 0x98e   : > { %3795 = shalt.err (!%p3792_p3)
}
 0x98f   : > { %s3796_s25 = scalar_lea.hbm %s5122_s21, 16  ;;  %s3800_s30 = scalar_lea.hbm %s5179_s15, 32 }
 0x990   : > { %p3797_p4 = scmp.ne.s32.totalorder %s5122_s21, %s3796_s25  ;;  %p3801_p9 = scmp.lt.u32.totalorder %s5122_s21, %s5179_s15 }
 0x991   : > { %p3802_p10 = scmp.lt.u32.totalorder %s3800_s30, %s3796_s25  ;;  %p3804_p12 = scmp.lt.u32.totalorder %s3796_s25, %s5122_s21 }
 0x992   : > { %p3798_p7 = pnand %p3797_p4, %p3970_p5 }
 0x993   : > { %p3803_p11 = por %p3802_p10, %p3801_p9 }
 0x994   : > { %p3799_p8 = pneg %p3798_p7 }
 0x995   : > { %p3805_p13 = por %p3804_p12, %p3803_p11 }
 0x997   : > { %p3806_p0 = pnand %p3805_p13, %p3799_p8 }
 0x999   : > { %3809 = shalt.err (!%p3806_p0)
}
 0x99a   : > { %3738 = dma.vmem_to_hbm [thread:$0]  (%p3970_p5), %s5124_s27, 16, %s5122_s21, %s2782_s16  }
 0x99b PF: > { %s5194_s17 = sld [smem:[#allocation7_spill]]  ;;  %s5195_s22 = sld [smem:[#allocation5_spill]] }
 0x9a1   : > { %p3744_p1 = scmp.ge.s32.totalorder %s5194_s17, 2  ;;  %s2806_s24 = sand.u32 1, %s5195_s22  }
 0x9a2   : > { %s2807_s29 = scalar_lea.sflag [#allocation3], %s2806_s24 }
 0x9a3   : > { %p3741_p2 = pnand %p3744_p1, %p3974_p6 }
 0x9a5   : > { %3827 = dma.done.wait (!%p3741_p2), %s2807_s29, 16  }
 0x9a6   : > { %3829 = vsyncadd (!%p3741_p2), %s2807_s29, 4294967280  ;;  %s5197_s21 = sld [smem:[#allocation8_spill]]  ;;  %s5198_s25 = sld [smem:[#allocation6_spill]] }
 0x9a7   : > { %s5199_s20 = sld [smem:[#allocation9_spill]]  ;;  %s5200_s18 = smov %s3836_s19 }
 0x9ac   : > { %p25_p3 = scmp.ge.s32.totalorder %s5197_s21, 4   ;;  %s5201_s19 = smov %s5198_s25 }
 0x9ae   :  { %27 = sbr.rel (!%p25_p3) target bundleno = 3 (0x3), region = 127 }
 0x9b5   :  { %2811 = vsyncpa [#allocation3], 1 }
 0x9b6   :  { %2813 = vsyncpa [#allocation3 + $0x1], 1 }

</bundles_post_ra>
